<compile_context>
chip_gen: v7x
topology: tpu7x:2x2x1
jax: 0.10.0
libtpu: 0.0.40
codegen_flags: <defaults>
</compile_context>

<pallas_src>
import functools
import math

import jax
import jax.numpy as jnp
from jax.experimental import pallas as pl
from jax.experimental.pallas import tpu as pltpu

LN_EPS = 1e-12


def _vmem_limit_bytes(default=48 * 1024 * 1024):
    """Generation-aware scoped-VMEM limit (~80% of physical, capped)."""
    try:
        info = pltpu.get_tpu_info()
        cap = getattr(info, "vmem_capacity_bytes", None)
        if cap:
            return max(default, min(int(cap * 0.8), 112 * 1024 * 1024))
    except Exception:
        pass
    return default


# ----------------------------- in-kernel helpers ------------------------------

def _layer_norm(x, gamma, beta):
    mean = jnp.mean(x, axis=-1, keepdims=True)
    var = jnp.mean((x - mean) ** 2, axis=-1, keepdims=True)
    return (x - mean) * jax.lax.rsqrt(var + LN_EPS) * gamma + beta


def _gelu(x):
    # tanh-approx GELU.
    # TODO(synk): switch to exact erf-based GELU if HF-BERT bit-match is needed.
    return 0.5 * x * (1.0 + jnp.tanh(0.7978845608028654 * (x + 0.044715 * x * x * x)))


# ------------------------------- Pallas kernel --------------------------------

def _bert_encoder_kernel(num_heads,
                         x_ref, emb_g_ref, emb_b_ref,
                         wqkv_ref, bqkv_ref, wo_ref, bo_ref,
                         g1_ref, be1_ref, w1_ref, b1_ref, w2_ref, b2_ref,
                         g2_ref, be2_ref, pw_ref, pb_ref,
                         out_ref, pooled_ref):
    """One grid step == one full BERT layer over the whole (B, S) batch.

    The activation lives in out_ref (constant block index across the layer
    grid axis -> VMEM-resident, written back to HBM only once at the end).
    """
    l = pl.program_id(0)
    last = pl.num_programs(0) - 1

    B, S, H = x_ref.shape
    NH = num_heads
    dh = H // NH

    # Layer 0: initialize the resident activation with the embedding LayerNorm.
    @pl.when(l == 0)
    def _():
        out_ref[...] = _layer_norm(x_ref[...], emb_g_ref[...], emb_b_ref[...])

    x = out_ref[...].reshape(B * S, H)                       # (B*S, H) f32
    xb = x.astype(jnp.bfloat16)

    # --- fused QKV projection (bf16 operands, f32 accumulate); softmax scale
    #     is pre-folded into the Q columns of wqkv/bqkv at prepare_params time.
    qkv = jnp.dot(xb, wqkv_ref[0], preferred_element_type=jnp.float32) + bqkv_ref[0]
    q = qkv[:, :H]
    k = qkv[:, H:2 * H]
    v = qkv[:, 2 * H:]

    def split_heads(t):                                      # (B*S,H) -> (B*NH,S,dh) bf16
        parts = []
        for b in range(B):
            tb = t[b * S:(b + 1) * S, :]                     # (S, H)
            parts.append(jnp.transpose(tb.reshape(S, NH, dh), (1, 0, 2)))
        return jnp.concatenate(parts, axis=0).astype(jnp.bfloat16)

    def merge_heads(t):                                      # (B*NH,S,dh) -> (B*S,H) f32
        parts = []
        for b in range(B):
            tb = t[b * NH:(b + 1) * NH]                      # (NH, S, dh)
            parts.append(jnp.transpose(tb, (1, 0, 2)).reshape(S, H))
        return jnp.concatenate(parts, axis=0)

    qh = split_heads(q)
    kh = split_heads(k)
    vh = split_heads(v)

    # --- batched-over-(batch*heads) attention (no mask: wrapper's all-ones mask) ---
    s = jnp.einsum('hqd,hkd->hqk', qh, kh,
                   preferred_element_type=jnp.float32)       # (B*NH, S, S) f32
    s = s - jnp.max(s, axis=-1, keepdims=True)
    e = jnp.exp(s)
    p = e * pl.reciprocal(jnp.sum(e, axis=-1, keepdims=True), approx=True)  # EUP divide

    ctx = jnp.einsum('hqk,hkd->hqd', p.astype(jnp.bfloat16), vh,
                     preferred_element_type=jnp.float32)     # (B*NH, S, dh)
    ctx = merge_heads(ctx)                                   # (B*S, H)

    # --- output projection + residual + LN ---
    attn = jnp.dot(ctx.astype(jnp.bfloat16), wo_ref[0],
                   preferred_element_type=jnp.float32) + bo_ref[0]
    h1 = _layer_norm(x + attn, g1_ref[0], be1_ref[0])

    # --- FFN (bf16 matmuls, f32 GELU) + residual + LN ---
    inter = _gelu(jnp.dot(h1.astype(jnp.bfloat16), w1_ref[0],
                          preferred_element_type=jnp.float32) + b1_ref[0])
    ffn = jnp.dot(inter.astype(jnp.bfloat16), w2_ref[0],
                  preferred_element_type=jnp.float32) + b2_ref[0]
    out = _layer_norm(h1 + ffn, g2_ref[0], be2_ref[0])       # (B*S, H) f32

    out_ref[...] = out.reshape(B, S, H).astype(out_ref.dtype)

    # --- fused pooler epilogue on the last layer ---
    @pl.when(l == last)
    def _():
        cls = jnp.concatenate([out[b * S:b * S + 1, :] for b in range(B)],
                              axis=0)                        # (B, H), CLS rows
        pooled = jnp.tanh(jnp.dot(cls.astype(jnp.bfloat16), pw_ref[...],
                                  preferred_element_type=jnp.float32) + pb_ref[...])
        pooled_ref[...] = pooled.astype(pooled_ref.dtype)


# ------------------------------- Pallas wrapper --------------------------------

def pallas_bert_encoder(emb, params, num_heads):
    """Run the full stacked-layer encoder in one pallas_call. grid=(L,)."""
    B, S, H = emb.shape
    L = params["wqkv"].shape[0]

    inputs = [emb,
              params["emb_ln_g"], params["emb_ln_b"],
              params["wqkv"], params["bqkv"], params["wo"], params["bo"],
              params["ln1_g"], params["ln1_b"],
              params["w1"], params["b1"], params["w2"], params["b2"],
              params["ln2_g"], params["ln2_b"],
              params["pool_w"], params["pool_b"]]

    def const_spec(shape):
        nd = len(shape)
        return pl.BlockSpec(shape, lambda l, _nd=nd: (0,) * _nd)

    def layer_spec(shape):
        block = (1,) + tuple(shape[1:])
        nrest = len(shape) - 1
        return pl.BlockSpec(block, lambda l, _n=nrest: (l,) + (0,) * _n)

    in_specs = [
        const_spec(emb.shape),                     # embeddings (constant across layers)
        const_spec(params["emb_ln_g"].shape),
        const_spec(params["emb_ln_b"].shape),
        layer_spec(params["wqkv"].shape),          # streamed per layer (double-buffered)
        layer_spec(params["bqkv"].shape),
        layer_spec(params["wo"].shape),
        layer_spec(params["bo"].shape),
        layer_spec(params["ln1_g"].shape),
        layer_spec(params["ln1_b"].shape),
        layer_spec(params["w1"].shape),
        layer_spec(params["b1"].shape),
        layer_spec(params["w2"].shape),
        layer_spec(params["b2"].shape),
        layer_spec(params["ln2_g"].shape),
        layer_spec(params["ln2_b"].shape),
        const_spec(params["pool_w"].shape),
        const_spec(params["pool_b"].shape),
    ]

    out_shape = (jax.ShapeDtypeStruct((B, S, H), jnp.float32),
                 jax.ShapeDtypeStruct((B, H), jnp.float32))
    out_specs = (pl.BlockSpec((B, S, H), lambda l: (0, 0, 0)),   # VMEM-resident across L
                 pl.BlockSpec((B, H), lambda l: (0, 0)))

    return pl.pallas_call(
        functools.partial(_bert_encoder_kernel, num_heads),
        out_shape=out_shape,
        grid=(L,),
        in_specs=in_specs,
        out_specs=out_specs,
        compiler_params=pltpu.CompilerParams(
            dimension_semantics=("arbitrary",),      # sequential layer dependence
            vmem_limit_bytes=_vmem_limit_bytes()),
    )(*inputs)


# ------------------------------- model (glue) --------------------------------

def init_bert_params(key, vocab, max_pos, n_token_types, H, FF, n_layers):
    keys = iter(jax.random.split(key, 8 + 8 * n_layers))
    std = 0.02
    p = {
        "word_emb": std * jax.random.normal(next(keys), (vocab, H), jnp.float32),
        "pos_emb": std * jax.random.normal(next(keys), (max_pos, H), jnp.float32),
        "tt_emb": std * jax.random.normal(next(keys), (n_token_types, H), jnp.float32),
        "emb_ln_g": jnp.ones((1, H), jnp.float32),
        "emb_ln_b": jnp.zeros((1, H), jnp.float32),
        "pool_w": std * jax.random.normal(next(keys), (H, H), jnp.float32),
        "pool_b": jnp.zeros((1, H), jnp.float32),
        "layers": [],
    }
    for _ in range(n_layers):
        lp = {
            "wq": std * jax.random.normal(next(keys), (H, H), jnp.float32),
            "bq": jnp.zeros((1, H), jnp.float32),
            "wk": std * jax.random.normal(next(keys), (H, H), jnp.float32),
            "bk": jnp.zeros((1, H), jnp.float32),
            "wv": std * jax.random.normal(next(keys), (H, H), jnp.float32),
            "bv": jnp.zeros((1, H), jnp.float32),
            "wo": std * jax.random.normal(next(keys), (H, H), jnp.float32),
            "bo": jnp.zeros((1, H), jnp.float32),
            "ln1_g": jnp.ones((1, H), jnp.float32),
            "ln1_b": jnp.zeros((1, H), jnp.float32),
            "w1": std * jax.random.normal(next(keys), (H, FF), jnp.float32),
            "b1": jnp.zeros((1, FF), jnp.float32),
            "w2": std * jax.random.normal(next(keys), (FF, H), jnp.float32),
            "b2": jnp.zeros((1, H), jnp.float32),
            "ln2_g": jnp.ones((1, H), jnp.float32),
            "ln2_b": jnp.zeros((1, H), jnp.float32),
        }
        p["layers"].append(lp)
    return p


def prepare_params(p, num_heads):
    """One-time host-side packing:
       * fuse Wq|Wk|Wv -> Wqkv with the 1/sqrt(dh) softmax scale folded into
         the Q columns (and bq),
       * stack per-layer tensors along a leading L axis so one pallas_call can
         stream them layer-by-layer,
       * cast matmul weights to bf16 (biases / LN params stay f32)."""
    H = p["pool_w"].shape[0]
    dh = H // num_heads
    scale = 1.0 / math.sqrt(dh)

    def stack(fn):
        return jnp.stack([fn(lp) for lp in p["layers"]], axis=0)

    return {
        "word_emb": p["word_emb"], "pos_emb": p["pos_emb"], "tt_emb": p["tt_emb"],
        "emb_ln_g": p["emb_ln_g"], "emb_ln_b": p["emb_ln_b"],
        "pool_w": p["pool_w"].astype(jnp.bfloat16), "pool_b": p["pool_b"],
        "wqkv": stack(lambda lp: jnp.concatenate(
            [lp["wq"] * scale, lp["wk"], lp["wv"]], axis=1)).astype(jnp.bfloat16),
        "bqkv": stack(lambda lp: jnp.concatenate(
            [lp["bq"] * scale, lp["bk"], lp["bv"]], axis=1)),
        "wo": stack(lambda lp: lp["wo"]).astype(jnp.bfloat16),
        "bo": stack(lambda lp: lp["bo"]),
        "ln1_g": stack(lambda lp: lp["ln1_g"]),
        "ln1_b": stack(lambda lp: lp["ln1_b"]),
        "w1": stack(lambda lp: lp["w1"]).astype(jnp.bfloat16),
        "b1": stack(lambda lp: lp["b1"]),
        "w2": stack(lambda lp: lp["w2"]).astype(jnp.bfloat16),
        "b2": stack(lambda lp: lp["b2"]),
        "ln2_g": stack(lambda lp: lp["ln2_g"]),
        "ln2_b": stack(lambda lp: lp["ln2_b"]),
    }


def bert_encoder_forward(question, question_len, params, num_heads):
    """Mirrors BertEncoder.forward: returns (encoded_layers[-1], pooled_out).

    question_len is unused (the wrapped BertModel is called without an
    attention mask, which defaults to all-ones)."""
    del question_len
    B, S = question.shape
    segment_ids = jnp.zeros_like(question)                     # as in the module

    # Embedding gathers are glue (plain JAX); everything downstream is Pallas.
    emb = (params["word_emb"][question]
           + params["pos_emb"][:S][None, :, :]
           + params["tt_emb"][segment_ids]).astype(jnp.float32)

    return pallas_bert_encoder(emb, params, num_heads)


# ----------------------------------- main -----------------------------------

if __name__ == "__main__":
    B, S = 2, 8                  # batch, sequence length
    H, NH, FF, L = 32, 4, 64, 2  # hidden (latent_size), heads, FFN, layers
    VOCAB, MAXPOS, NTT = 50, 16, 2

    key = jax.random.PRNGKey(0)
    kq, kp = jax.random.split(key)
    params = prepare_params(init_bert_params(kp, VOCAB, MAXPOS, NTT, H, FF, L), NH)

    question = jax.random.randint(kq, (B, S), 0, VOCAB, dtype=jnp.int32)
    question_len = jnp.full((B,), S, dtype=jnp.int32)

    last_hidden, pooled = bert_encoder_forward(question, question_len, params, NH)
    jax.block_until_ready((last_hidden, pooled))

    assert last_hidden.shape == (B, S, H)
    assert pooled.shape == (B, H)
    assert bool(jnp.all(jnp.isfinite(last_hidden)))
    assert bool(jnp.all(jnp.isfinite(pooled)))
    print("KERNEL_OK")
</pallas_src>

<mosaic_0001>
module attributes {stable_mosaic.version = 11 : i64} {
  func.func @_bert_encoder_kernel(%arg0: i32, %arg1: memref<2x8x32xf32, #tpu.memory_space<vmem>>, %arg2: memref<1x32xf32, #tpu.memory_space<vmem>>, %arg3: memref<1x32xf32, #tpu.memory_space<vmem>>, %arg4: memref<1x32x96xbf16, #tpu.memory_space<vmem>>, %arg5: memref<1x1x96xf32, #tpu.memory_space<vmem>>, %arg6: memref<1x32x32xbf16, #tpu.memory_space<vmem>>, %arg7: memref<1x1x32xf32, #tpu.memory_space<vmem>>, %arg8: memref<1x1x32xf32, #tpu.memory_space<vmem>>, %arg9: memref<1x1x32xf32, #tpu.memory_space<vmem>>, %arg10: memref<1x32x64xbf16, #tpu.memory_space<vmem>>, %arg11: memref<1x1x64xf32, #tpu.memory_space<vmem>>, %arg12: memref<1x64x32xbf16, #tpu.memory_space<vmem>>, %arg13: memref<1x1x32xf32, #tpu.memory_space<vmem>>, %arg14: memref<1x1x32xf32, #tpu.memory_space<vmem>>, %arg15: memref<1x1x32xf32, #tpu.memory_space<vmem>>, %arg16: memref<32x32xbf16, #tpu.memory_space<vmem>>, %arg17: memref<1x32xf32, #tpu.memory_space<vmem>>, %arg18: memref<2x8x32xf32, #tpu.memory_space<vmem>>, %arg19: memref<2x32xf32, #tpu.memory_space<vmem>>) attributes {dimension_semantics = [#tpu.dimension_semantics<arbitrary>], iteration_bounds = array<i64: 2>, scalar_prefetch = 0 : i64, scratch_operands = 0 : i64, tpu.core_type = #tpu.core_type<tc>, window_params = [{pipeline_mode = #tpu.pipeline_mode<synchronous>, transform_indices = @transform_0, window_bounds = array<i64: 2, 8, 32>}, {pipeline_mode = #tpu.pipeline_mode<synchronous>, transform_indices = @transform_1, window_bounds = array<i64: 1, 32>}, {pipeline_mode = #tpu.pipeline_mode<synchronous>, transform_indices = @transform_2, window_bounds = array<i64: 1, 32>}, {transform_indices = @transform_3, window_bounds = array<i64: 1, 32, 96>}, {transform_indices = @transform_4, window_bounds = array<i64: 1, 1, 96>}, {transform_indices = @transform_5, window_bounds = array<i64: 1, 32, 32>}, {transform_indices = @transform_6, window_bounds = array<i64: 1, 1, 32>}, {transform_indices = @transform_7, window_bounds = array<i64: 1, 1, 32>}, {transform_indices = @transform_8, window_bounds = array<i64: 1, 1, 32>}, {transform_indices = @transform_9, window_bounds = array<i64: 1, 32, 64>}, {transform_indices = @transform_10, window_bounds = array<i64: 1, 1, 64>}, {transform_indices = @transform_11, window_bounds = array<i64: 1, 64, 32>}, {transform_indices = @transform_12, window_bounds = array<i64: 1, 1, 32>}, {transform_indices = @transform_13, window_bounds = array<i64: 1, 1, 32>}, {transform_indices = @transform_14, window_bounds = array<i64: 1, 1, 32>}, {pipeline_mode = #tpu.pipeline_mode<synchronous>, transform_indices = @transform_15, window_bounds = array<i64: 32, 32>}, {pipeline_mode = #tpu.pipeline_mode<synchronous>, transform_indices = @transform_16, window_bounds = array<i64: 1, 32>}, {pipeline_mode = #tpu.pipeline_mode<synchronous>, transform_indices = @transform_17, window_bounds = array<i64: 2, 8, 32>}, {pipeline_mode = #tpu.pipeline_mode<synchronous>, transform_indices = @transform_18, window_bounds = array<i64: 2, 32>}]} {
    %c0_i32 = arith.constant 0 : i32
    %0 = arith.cmpi eq, %arg0, %c0_i32 : i32
    %1 = arith.extui %0 : i1 to i32
    %c0_i32_0 = arith.constant 0 : i32
    %2 = arith.cmpi ne, %1, %c0_i32_0 : i32
    scf.if %2 {
      %c0_64 = arith.constant 0 : index
      %c0_65 = arith.constant 0 : index
      %c0_66 = arith.constant 0 : index
      %156 = vector.load %arg1[%c0_64, %c0_65, %c0_66] : memref<2x8x32xf32, #tpu.memory_space<vmem>>, vector<2x8x32xf32>
      %c0_67 = arith.constant 0 : index
      %c0_68 = arith.constant 0 : index
      %157 = vector.load %arg2[%c0_67, %c0_68] : memref<1x32xf32, #tpu.memory_space<vmem>>, vector<1x32xf32>
      %c0_69 = arith.constant 0 : index
      %c0_70 = arith.constant 0 : index
      %158 = vector.load %arg3[%c0_69, %c0_70] : memref<1x32xf32, #tpu.memory_space<vmem>>, vector<1x32xf32>
      %cst_71 = arith.constant dense<0.000000e+00> : vector<2x8xf32>
      %159 = vector.multi_reduction <add>, %156, %cst_71 [2] : vector<2x8x32xf32> to vector<2x8xf32>
      %160 = vector.shape_cast %159 : vector<2x8xf32> to vector<2x8x1xf32>
      %cst_72 = arith.constant 3.200000e+01 : f32
      %161 = vector.broadcast %cst_72 : f32 to vector<2x8x1xf32>
      %162 = arith.divf %160, %161 : vector<2x8x1xf32>
      %163 = vector.broadcast %162 : vector<2x8x1xf32> to vector<2x8x32xf32>
      %164 = arith.subf %156, %163 : vector<2x8x32xf32>
      %165 = arith.mulf %164, %164 : vector<2x8x32xf32>
      %cst_73 = arith.constant dense<0.000000e+00> : vector<2x8xf32>
      %166 = vector.multi_reduction <add>, %165, %cst_73 [2] : vector<2x8x32xf32> to vector<2x8xf32>
      %167 = vector.shape_cast %166 : vector<2x8xf32> to vector<2x8x1xf32>
      %cst_74 = arith.constant 3.200000e+01 : f32
      %168 = vector.broadcast %cst_74 : f32 to vector<2x8x1xf32>
      %169 = arith.divf %167, %168 : vector<2x8x1xf32>
      %170 = vector.broadcast %162 : vector<2x8x1xf32> to vector<2x8x32xf32>
      %171 = arith.subf %156, %170 : vector<2x8x32xf32>
      %cst_75 = arith.constant 9.99999996E-13 : f32
      %172 = vector.broadcast %cst_75 : f32 to vector<2x8x1xf32>
      %173 = arith.addf %169, %172 : vector<2x8x1xf32>
      %174 = math.rsqrt %173 : vector<2x8x1xf32>
      %175 = vector.broadcast %174 : vector<2x8x1xf32> to vector<2x8x32xf32>
      %176 = arith.mulf %171, %175 : vector<2x8x32xf32>
      %177 = vector.shape_cast %157 : vector<1x32xf32> to vector<1x1x32xf32>
      %178 = vector.broadcast %177 : vector<1x1x32xf32> to vector<2x8x32xf32>
      %179 = arith.mulf %176, %178 : vector<2x8x32xf32>
      %180 = vector.shape_cast %158 : vector<1x32xf32> to vector<1x1x32xf32>
      %181 = vector.broadcast %180 : vector<1x1x32xf32> to vector<2x8x32xf32>
      %182 = arith.addf %179, %181 : vector<2x8x32xf32>
      %c0_76 = arith.constant 0 : index
      %c0_77 = arith.constant 0 : index
      %c0_78 = arith.constant 0 : index
      %183 = vector.load %arg18[%c0_76, %c0_77, %c0_78] : memref<2x8x32xf32, #tpu.memory_space<vmem>>, vector<2x8x32xf32>
      tpu.vector_store %arg18[%c0_76, %c0_77, %c0_78], %182 {strides = array<i32>} : memref<2x8x32xf32, #tpu.memory_space<vmem>>, vector<2x8x32xf32>,
    } else {
    }
    %c0 = arith.constant 0 : index
    %c0_1 = arith.constant 0 : index
    %c0_2 = arith.constant 0 : index
    %3 = vector.load %arg18[%c0, %c0_1, %c0_2] : memref<2x8x32xf32, #tpu.memory_space<vmem>>, vector<2x8x32xf32>
    %4 = vector.shape_cast %3 : vector<2x8x32xf32> to vector<16x32xf32>
    %5 = arith.truncf %4 : vector<16x32xf32> to vector<16x32xbf16>
    %c0_3 = arith.constant 0 : index
    %c0_4 = arith.constant 0 : index
    %c0_5 = arith.constant 0 : index
    %6 = vector.load %arg4[%c0_3, %c0_4, %c0_5] : memref<1x32x96xbf16, #tpu.memory_space<vmem>>, vector<1x32x96xbf16>
    %7 = vector.shape_cast %6 : vector<1x32x96xbf16> to vector<32x96xbf16>
    %cst = arith.constant dense<0.000000e+00> : vector<16x96xf32>
    %8 = tpu.matmul %5, %7, %cst {dimension_numbers = #tpu.dot_dimension_numbers<[1], [0], [0], [1], [0, 0, 1, 1], [], []>} : vector<16x32xbf16>, vector<32x96xbf16>, vector<16x96xf32> -> vector<16x96xf32>
    %c0_6 = arith.constant 0 : index
    %c0_7 = arith.constant 0 : index
    %c0_8 = arith.constant 0 : index
    %9 = vector.load %arg5[%c0_6, %c0_7, %c0_8] : memref<1x1x96xf32, #tpu.memory_space<vmem>>, vector<1x1x96xf32>
    %10 = vector.shape_cast %9 : vector<1x1x96xf32> to vector<1x96xf32>
    %11 = vector.broadcast %10 : vector<1x96xf32> to vector<16x96xf32>
    %12 = arith.addf %8, %11 : vector<16x96xf32>
    %13 = vector.extract_strided_slice %12 {offsets = [0, 0], sizes = [16, 32], strides = [1, 1]} : vector<16x96xf32> to vector<16x32xf32>
    %14 = vector.extract_strided_slice %12 {offsets = [0, 32], sizes = [16, 32], strides = [1, 1]} : vector<16x96xf32> to vector<16x32xf32>
    %15 = vector.extract_strided_slice %12 {offsets = [0, 64], sizes = [16, 32], strides = [1, 1]} : vector<16x96xf32> to vector<16x32xf32>
    %16 = vector.extract_strided_slice %13 {offsets = [0, 0], sizes = [8, 32], strides = [1, 1]} : vector<16x32xf32> to vector<8x32xf32>
    %17 = vector.shape_cast %16 : vector<8x32xf32> to vector<8x4x8xf32>
    %18 = tpu.transpose %17, [1, 0, 2] : vector<8x4x8xf32> -> vector<4x8x8xf32>
    %19 = vector.extract_strided_slice %13 {offsets = [8, 0], sizes = [8, 32], strides = [1, 1]} : vector<16x32xf32> to vector<8x32xf32>
    %20 = vector.shape_cast %19 : vector<8x32xf32> to vector<8x4x8xf32>
    %21 = tpu.transpose %20, [1, 0, 2] : vector<8x4x8xf32> -> vector<4x8x8xf32>
    %22 = tpu.concatenate %18, %21 in 0 : vector<4x8x8xf32>, vector<4x8x8xf32> -> vector<8x8x8xf32>
    %23 = arith.truncf %22 : vector<8x8x8xf32> to vector<8x8x8xbf16>
    %24 = vector.extract_strided_slice %14 {offsets = [0, 0], sizes = [8, 32], strides = [1, 1]} : vector<16x32xf32> to vector<8x32xf32>
    %25 = vector.shape_cast %24 : vector<8x32xf32> to vector<8x4x8xf32>
    %26 = tpu.transpose %25, [1, 0, 2] : vector<8x4x8xf32> -> vector<4x8x8xf32>
    %27 = vector.extract_strided_slice %14 {offsets = [8, 0], sizes = [8, 32], strides = [1, 1]} : vector<16x32xf32> to vector<8x32xf32>
    %28 = vector.shape_cast %27 : vector<8x32xf32> to vector<8x4x8xf32>
    %29 = tpu.transpose %28, [1, 0, 2] : vector<8x4x8xf32> -> vector<4x8x8xf32>
    %30 = tpu.concatenate %26, %29 in 0 : vector<4x8x8xf32>, vector<4x8x8xf32> -> vector<8x8x8xf32>
    %31 = arith.truncf %30 : vector<8x8x8xf32> to vector<8x8x8xbf16>
    %32 = vector.extract_strided_slice %15 {offsets = [0, 0], sizes = [8, 32], strides = [1, 1]} : vector<16x32xf32> to vector<8x32xf32>
    %33 = vector.shape_cast %32 : vector<8x32xf32> to vector<8x4x8xf32>
    %34 = tpu.transpose %33, [1, 0, 2] : vector<8x4x8xf32> -> vector<4x8x8xf32>
    %35 = vector.extract_strided_slice %15 {offsets = [8, 0], sizes = [8, 32], strides = [1, 1]} : vector<16x32xf32> to vector<8x32xf32>
    %36 = vector.shape_cast %35 : vector<8x32xf32> to vector<8x4x8xf32>
    %37 = tpu.transpose %36, [1, 0, 2] : vector<8x4x8xf32> -> vector<4x8x8xf32>
    %38 = tpu.concatenate %34, %37 in 0 : vector<4x8x8xf32>, vector<4x8x8xf32> -> vector<8x8x8xf32>
    %39 = arith.truncf %38 : vector<8x8x8xf32> to vector<8x8x8xbf16>
    "tpu.trace_start"() <{level = 10 : i32, message = "hqd,hkd->hqk"}> : () -> ()
    %cst_9 = arith.constant dense<0.000000e+00> : vector<8x8x8xf32>
    %40 = tpu.matmul %23, %31, %cst_9 {dimension_numbers = #tpu.dot_dimension_numbers<[2], [2], [1], [1], [0, 0, 0, 1, 1, 1], [0], [0]>} : vector<8x8x8xbf16>, vector<8x8x8xbf16>, vector<8x8x8xf32> -> vector<8x8x8xf32>
    "tpu.trace_stop"() : () -> ()
    %cst_10 = arith.constant dense<0xFF800000> : vector<8x8xf32>
    %41 = vector.multi_reduction <maximumf>, %40, %cst_10 [2] : vector<8x8x8xf32> to vector<8x8xf32>
    %42 = vector.shape_cast %41 : vector<8x8xf32> to vector<8x8x1xf32>
    %43 = vector.broadcast %42 : vector<8x8x1xf32> to vector<8x8x8xf32>
    %44 = arith.subf %40, %43 : vector<8x8x8xf32>
    %45 = math.exp %44 : vector<8x8x8xf32>
    %cst_11 = arith.constant dense<0.000000e+00> : vector<8x8xf32>
    %46 = vector.multi_reduction <add>, %45, %cst_11 [2] : vector<8x8x8xf32> to vector<8x8xf32>
    %47 = vector.shape_cast %46 : vector<8x8xf32> to vector<8x8x1xf32>
    %48 = tpu.reciprocal %47 {approx = true} : vector<8x8x1xf32> -> vector<8x8x1xf32>
    %49 = vector.broadcast %48 : vector<8x8x1xf32> to vector<8x8x8xf32>
    %50 = arith.mulf %45, %49 : vector<8x8x8xf32>
    %51 = arith.truncf %50 : vector<8x8x8xf32> to vector<8x8x8xbf16>
    "tpu.trace_start"() <{level = 10 : i32, message = "hqk,hkd->hqd"}> : () -> ()
    %cst_12 = arith.constant dense<0.000000e+00> : vector<8x8x8xf32>
    %52 = tpu.matmul %51, %39, %cst_12 {dimension_numbers = #tpu.dot_dimension_numbers<[2], [1], [1], [2], [0, 0, 0, 1, 1, 2], [0], [0]>} : vector<8x8x8xbf16>, vector<8x8x8xbf16>, vector<8x8x8xf32> -> vector<8x8x8xf32>
    "tpu.trace_stop"() : () -> ()
    %53 = vector.extract_strided_slice %52 {offsets = [0, 0, 0], sizes = [4, 8, 8], strides = [1, 1, 1]} : vector<8x8x8xf32> to vector<4x8x8xf32>
    %54 = tpu.transpose %53, [1, 0, 2] : vector<4x8x8xf32> -> vector<8x4x8xf32>
    %55 = vector.shape_cast %54 : vector<8x4x8xf32> to vector<8x32xf32>
    %56 = vector.extract_strided_slice %52 {offsets = [4, 0, 0], sizes = [4, 8, 8], strides = [1, 1, 1]} : vector<8x8x8xf32> to vector<4x8x8xf32>
    %57 = tpu.transpose %56, [1, 0, 2] : vector<4x8x8xf32> -> vector<8x4x8xf32>
    %58 = vector.shape_cast %57 : vector<8x4x8xf32> to vector<8x32xf32>
    %59 = tpu.concatenate %55, %58 in 0 : vector<8x32xf32>, vector<8x32xf32> -> vector<16x32xf32>
    %60 = arith.truncf %59 : vector<16x32xf32> to vector<16x32xbf16>
    %c0_13 = arith.constant 0 : index
    %c0_14 = arith.constant 0 : index
    %c0_15 = arith.constant 0 : index
    %61 = vector.load %arg6[%c0_13, %c0_14, %c0_15] : memref<1x32x32xbf16, #tpu.memory_space<vmem>>, vector<1x32x32xbf16>
    %62 = vector.shape_cast %61 : vector<1x32x32xbf16> to vector<32x32xbf16>
    %cst_16 = arith.constant dense<0.000000e+00> : vector<16x32xf32>
    %63 = tpu.matmul %60, %62, %cst_16 {dimension_numbers = #tpu.dot_dimension_numbers<[1], [0], [0], [1], [0, 0, 1, 1], [], []>} : vector<16x32xbf16>, vector<32x32xbf16>, vector<16x32xf32> -> vector<16x32xf32>
    %c0_17 = arith.constant 0 : index
    %c0_18 = arith.constant 0 : index
    %c0_19 = arith.constant 0 : index
    %64 = vector.load %arg7[%c0_17, %c0_18, %c0_19] : memref<1x1x32xf32, #tpu.memory_space<vmem>>, vector<1x1x32xf32>
    %65 = vector.shape_cast %64 : vector<1x1x32xf32> to vector<1x32xf32>
    %66 = vector.broadcast %65 : vector<1x32xf32> to vector<16x32xf32>
    %67 = arith.addf %63, %66 : vector<16x32xf32>
    %68 = arith.addf %4, %67 : vector<16x32xf32>
    %c0_20 = arith.constant 0 : index
    %c0_21 = arith.constant 0 : index
    %c0_22 = arith.constant 0 : index
    %69 = vector.load %arg8[%c0_20, %c0_21, %c0_22] : memref<1x1x32xf32, #tpu.memory_space<vmem>>, vector<1x1x32xf32>
    %70 = vector.shape_cast %69 : vector<1x1x32xf32> to vector<1x32xf32>
    %c0_23 = arith.constant 0 : index
    %c0_24 = arith.constant 0 : index
    %c0_25 = arith.constant 0 : index
    %71 = vector.load %arg9[%c0_23, %c0_24, %c0_25] : memref<1x1x32xf32, #tpu.memory_space<vmem>>, vector<1x1x32xf32>
    %72 = vector.shape_cast %71 : vector<1x1x32xf32> to vector<1x32xf32>
    %cst_26 = arith.constant dense<0.000000e+00> : vector<16xf32>
    %73 = vector.multi_reduction <add>, %68, %cst_26 [1] : vector<16x32xf32> to vector<16xf32>
    %74 = vector.shape_cast %73 : vector<16xf32> to vector<16x1xf32>
    %cst_27 = arith.constant 3.200000e+01 : f32
    %75 = vector.broadcast %cst_27 : f32 to vector<16x1xf32>
    %76 = arith.divf %74, %75 : vector<16x1xf32>
    %77 = vector.broadcast %76 : vector<16x1xf32> to vector<16x32xf32>
    %78 = arith.subf %68, %77 : vector<16x32xf32>
    %79 = arith.mulf %78, %78 : vector<16x32xf32>
    %cst_28 = arith.constant dense<0.000000e+00> : vector<16xf32>
    %80 = vector.multi_reduction <add>, %79, %cst_28 [1] : vector<16x32xf32> to vector<16xf32>
    %81 = vector.shape_cast %80 : vector<16xf32> to vector<16x1xf32>
    %cst_29 = arith.constant 3.200000e+01 : f32
    %82 = vector.broadcast %cst_29 : f32 to vector<16x1xf32>
    %83 = arith.divf %81, %82 : vector<16x1xf32>
    %84 = vector.broadcast %76 : vector<16x1xf32> to vector<16x32xf32>
    %85 = arith.subf %68, %84 : vector<16x32xf32>
    %cst_30 = arith.constant 9.99999996E-13 : f32
    %86 = vector.broadcast %cst_30 : f32 to vector<16x1xf32>
    %87 = arith.addf %83, %86 : vector<16x1xf32>
    %88 = math.rsqrt %87 : vector<16x1xf32>
    %89 = vector.broadcast %88 : vector<16x1xf32> to vector<16x32xf32>
    %90 = arith.mulf %85, %89 : vector<16x32xf32>
    %91 = vector.broadcast %70 : vector<1x32xf32> to vector<16x32xf32>
    %92 = arith.mulf %90, %91 : vector<16x32xf32>
    %93 = vector.broadcast %72 : vector<1x32xf32> to vector<16x32xf32>
    %94 = arith.addf %92, %93 : vector<16x32xf32>
    %95 = arith.truncf %94 : vector<16x32xf32> to vector<16x32xbf16>
    %c0_31 = arith.constant 0 : index
    %c0_32 = arith.constant 0 : index
    %c0_33 = arith.constant 0 : index
    %96 = vector.load %arg10[%c0_31, %c0_32, %c0_33] : memref<1x32x64xbf16, #tpu.memory_space<vmem>>, vector<1x32x64xbf16>
    %97 = vector.shape_cast %96 : vector<1x32x64xbf16> to vector<32x64xbf16>
    %cst_34 = arith.constant dense<0.000000e+00> : vector<16x64xf32>
    %98 = tpu.matmul %95, %97, %cst_34 {dimension_numbers = #tpu.dot_dimension_numbers<[1], [0], [0], [1], [0, 0, 1, 1], [], []>} : vector<16x32xbf16>, vector<32x64xbf16>, vector<16x64xf32> -> vector<16x64xf32>
    %c0_35 = arith.constant 0 : index
    %c0_36 = arith.constant 0 : index
    %c0_37 = arith.constant 0 : index
    %99 = vector.load %arg11[%c0_35, %c0_36, %c0_37] : memref<1x1x64xf32, #tpu.memory_space<vmem>>, vector<1x1x64xf32>
    %100 = vector.shape_cast %99 : vector<1x1x64xf32> to vector<1x64xf32>
    %101 = vector.broadcast %100 : vector<1x64xf32> to vector<16x64xf32>
    %102 = arith.addf %98, %101 : vector<16x64xf32>
    %cst_38 = arith.constant 5.000000e-01 : f32
    %103 = vector.broadcast %cst_38 : f32 to vector<16x64xf32>
    %104 = arith.mulf %103, %102 : vector<16x64xf32>
    %cst_39 = arith.constant 4.471500e-02 : f32
    %105 = vector.broadcast %cst_39 : f32 to vector<16x64xf32>
    %106 = arith.mulf %105, %102 : vector<16x64xf32>
    %107 = arith.mulf %106, %102 : vector<16x64xf32>
    %108 = arith.mulf %107, %102 : vector<16x64xf32>
    %109 = arith.addf %102, %108 : vector<16x64xf32>
    %cst_40 = arith.constant 0.797884583 : f32
    %110 = vector.broadcast %cst_40 : f32 to vector<16x64xf32>
    %111 = arith.mulf %110, %109 : vector<16x64xf32>
    %112 = math.tanh %111 : vector<16x64xf32>
    %cst_41 = arith.constant 1.000000e+00 : f32
    %113 = vector.broadcast %cst_41 : f32 to vector<16x64xf32>
    %114 = arith.addf %113, %112 : vector<16x64xf32>
    %115 = arith.mulf %104, %114 : vector<16x64xf32>
    %116 = arith.truncf %115 : vector<16x64xf32> to vector<16x64xbf16>
    %c0_42 = arith.constant 0 : index
    %c0_43 = arith.constant 0 : index
    %c0_44 = arith.constant 0 : index
    %117 = vector.load %arg12[%c0_42, %c0_43, %c0_44] : memref<1x64x32xbf16, #tpu.memory_space<vmem>>, vector<1x64x32xbf16>
    %118 = vector.shape_cast %117 : vector<1x64x32xbf16> to vector<64x32xbf16>
    %cst_45 = arith.constant dense<0.000000e+00> : vector<16x32xf32>
    %119 = tpu.matmul %116, %118, %cst_45 {dimension_numbers = #tpu.dot_dimension_numbers<[1], [0], [0], [1], [0, 0, 1, 1], [], []>} : vector<16x64xbf16>, vector<64x32xbf16>, vector<16x32xf32> -> vector<16x32xf32>
    %c0_46 = arith.constant 0 : index
    %c0_47 = arith.constant 0 : index
    %c0_48 = arith.constant 0 : index
    %120 = vector.load %arg13[%c0_46, %c0_47, %c0_48] : memref<1x1x32xf32, #tpu.memory_space<vmem>>, vector<1x1x32xf32>
    %121 = vector.shape_cast %120 : vector<1x1x32xf32> to vector<1x32xf32>
    %122 = vector.broadcast %121 : vector<1x32xf32> to vector<16x32xf32>
    %123 = arith.addf %119, %122 : vector<16x32xf32>
    %124 = arith.addf %94, %123 : vector<16x32xf32>
    %c0_49 = arith.constant 0 : index
    %c0_50 = arith.constant 0 : index
    %c0_51 = arith.constant 0 : index
    %125 = vector.load %arg14[%c0_49, %c0_50, %c0_51] : memref<1x1x32xf32, #tpu.memory_space<vmem>>, vector<1x1x32xf32>
    %126 = vector.shape_cast %125 : vector<1x1x32xf32> to vector<1x32xf32>
    %c0_52 = arith.constant 0 : index
    %c0_53 = arith.constant 0 : index
    %c0_54 = arith.constant 0 : index
    %127 = vector.load %arg15[%c0_52, %c0_53, %c0_54] : memref<1x1x32xf32, #tpu.memory_space<vmem>>, vector<1x1x32xf32>
    %128 = vector.shape_cast %127 : vector<1x1x32xf32> to vector<1x32xf32>
    %cst_55 = arith.constant dense<0.000000e+00> : vector<16xf32>
    %129 = vector.multi_reduction <add>, %124, %cst_55 [1] : vector<16x32xf32> to vector<16xf32>
    %130 = vector.shape_cast %129 : vector<16xf32> to vector<16x1xf32>
    %cst_56 = arith.constant 3.200000e+01 : f32
    %131 = vector.broadcast %cst_56 : f32 to vector<16x1xf32>
    %132 = arith.divf %130, %131 : vector<16x1xf32>
    %133 = vector.broadcast %132 : vector<16x1xf32> to vector<16x32xf32>
    %134 = arith.subf %124, %133 : vector<16x32xf32>
    %135 = arith.mulf %134, %134 : vector<16x32xf32>
    %cst_57 = arith.constant dense<0.000000e+00> : vector<16xf32>
    %136 = vector.multi_reduction <add>, %135, %cst_57 [1] : vector<16x32xf32> to vector<16xf32>
    %137 = vector.shape_cast %136 : vector<16xf32> to vector<16x1xf32>
    %cst_58 = arith.constant 3.200000e+01 : f32
    %138 = vector.broadcast %cst_58 : f32 to vector<16x1xf32>
    %139 = arith.divf %137, %138 : vector<16x1xf32>
    %140 = vector.broadcast %132 : vector<16x1xf32> to vector<16x32xf32>
    %141 = arith.subf %124, %140 : vector<16x32xf32>
    %cst_59 = arith.constant 9.99999996E-13 : f32
    %142 = vector.broadcast %cst_59 : f32 to vector<16x1xf32>
    %143 = arith.addf %139, %142 : vector<16x1xf32>
    %144 = math.rsqrt %143 : vector<16x1xf32>
    %145 = vector.broadcast %144 : vector<16x1xf32> to vector<16x32xf32>
    %146 = arith.mulf %141, %145 : vector<16x32xf32>
    %147 = vector.broadcast %126 : vector<1x32xf32> to vector<16x32xf32>
    %148 = arith.mulf %146, %147 : vector<16x32xf32>
    %149 = vector.broadcast %128 : vector<1x32xf32> to vector<16x32xf32>
    %150 = arith.addf %148, %149 : vector<16x32xf32>
    %151 = vector.shape_cast %150 : vector<16x32xf32> to vector<2x8x32xf32>
    %c0_60 = arith.constant 0 : index
    %c0_61 = arith.constant 0 : index
    %c0_62 = arith.constant 0 : index
    %152 = vector.load %arg18[%c0_60, %c0_61, %c0_62] : memref<2x8x32xf32, #tpu.memory_space<vmem>>, vector<2x8x32xf32>
    tpu.vector_store %arg18[%c0_60, %c0_61, %c0_62], %151 {strides = array<i32>} : memref<2x8x32xf32, #tpu.memory_space<vmem>>, vector<2x8x32xf32>,
    %c1_i32 = arith.constant 1 : i32
    %153 = arith.cmpi eq, %arg0, %c1_i32 : i32
    %154 = arith.extui %153 : i1 to i32
    %c0_i32_63 = arith.constant 0 : i32
    %155 = arith.cmpi ne, %154, %c0_i32_63 : i32
    scf.if %155 {
      %156 = vector.extract_strided_slice %150 {offsets = [0, 0], sizes = [1, 32], strides = [1, 1]} : vector<16x32xf32> to vector<1x32xf32>
      %157 = vector.extract_strided_slice %150 {offsets = [8, 0], sizes = [1, 32], strides = [1, 1]} : vector<16x32xf32> to vector<1x32xf32>
      %158 = tpu.concatenate %156, %157 in 0 : vector<1x32xf32>, vector<1x32xf32> -> vector<2x32xf32>
      %159 = arith.truncf %158 : vector<2x32xf32> to vector<2x32xbf16>
      %c0_64 = arith.constant 0 : index
      %c0_65 = arith.constant 0 : index
      %160 = vector.load %arg16[%c0_64, %c0_65] : memref<32x32xbf16, #tpu.memory_space<vmem>>, vector<32x32xbf16>
      %cst_66 = arith.constant dense<0.000000e+00> : vector<2x32xf32>
      %161 = tpu.matmul %159, %160, %cst_66 {dimension_numbers = #tpu.dot_dimension_numbers<[1], [0], [0], [1], [0, 0, 1, 1], [], []>} : vector<2x32xbf16>, vector<32x32xbf16>, vector<2x32xf32> -> vector<2x32xf32>
      %c0_67 = arith.constant 0 : index
      %c0_68 = arith.constant 0 : index
      %162 = vector.load %arg17[%c0_67, %c0_68] : memref<1x32xf32, #tpu.memory_space<vmem>>, vector<1x32xf32>
      %163 = vector.broadcast %162 : vector<1x32xf32> to vector<2x32xf32>
      %164 = arith.addf %161, %163 : vector<2x32xf32>
      %165 = math.tanh %164 : vector<2x32xf32>
      %c0_69 = arith.constant 0 : index
      %c0_70 = arith.constant 0 : index
      %166 = vector.load %arg19[%c0_69, %c0_70] : memref<2x32xf32, #tpu.memory_space<vmem>>, vector<2x32xf32>
      tpu.vector_store %arg19[%c0_69, %c0_70], %165 {strides = array<i32>} : memref<2x32xf32, #tpu.memory_space<vmem>>, vector<2x32xf32>,
    } else {
    }
    return
  }
  func.func @transform_0(%arg0: i32) -> (i32, i32, i32) {
    %c0_i32 = arith.constant 0 : i32
    %c0_i32_0 = arith.constant 0 : i32
    %c0_i32_1 = arith.constant 0 : i32
    %c0_i32_2 = arith.constant 0 : i32
    return %c0_i32, %c0_i32_0, %c0_i32_1 : i32, i32, i32
  }
  func.func @transform_1(%arg0: i32) -> (i32, i32) {
    %c0_i32 = arith.constant 0 : i32
    %c0_i32_0 = arith.constant 0 : i32
    %c0_i32_1 = arith.constant 0 : i32
    return %c0_i32, %c0_i32_0 : i32, i32
  }
  func.func @transform_2(%arg0: i32) -> (i32, i32) {
    %c0_i32 = arith.constant 0 : i32
    %c0_i32_0 = arith.constant 0 : i32
    %c0_i32_1 = arith.constant 0 : i32
    return %c0_i32, %c0_i32_0 : i32, i32
  }
  func.func @transform_3(%arg0: i32) -> (i32, i32, i32) {
    %c0_i32 = arith.constant 0 : i32
    %c0_i32_0 = arith.constant 0 : i32
    %c0_i32_1 = arith.constant 0 : i32
    return %arg0, %c0_i32, %c0_i32_0 : i32, i32, i32
  }
  func.func @transform_4(%arg0: i32) -> (i32, i32, i32) {
    %c0_i32 = arith.constant 0 : i32
    %c0_i32_0 = arith.constant 0 : i32
    %c0_i32_1 = arith.constant 0 : i32
    return %arg0, %c0_i32, %c0_i32_0 : i32, i32, i32
  }
  func.func @transform_5(%arg0: i32) -> (i32, i32, i32) {
    %c0_i32 = arith.constant 0 : i32
    %c0_i32_0 = arith.constant 0 : i32
    %c0_i32_1 = arith.constant 0 : i32
    return %arg0, %c0_i32, %c0_i32_0 : i32, i32, i32
  }
  func.func @transform_6(%arg0: i32) -> (i32, i32, i32) {
    %c0_i32 = arith.constant 0 : i32
    %c0_i32_0 = arith.constant 0 : i32
    %c0_i32_1 = arith.constant 0 : i32
    return %arg0, %c0_i32, %c0_i32_0 : i32, i32, i32
  }
  func.func @transform_7(%arg0: i32) -> (i32, i32, i32) {
    %c0_i32 = arith.constant 0 : i32
    %c0_i32_0 = arith.constant 0 : i32
    %c0_i32_1 = arith.constant 0 : i32
    return %arg0, %c0_i32, %c0_i32_0 : i32, i32, i32
  }
  func.func @transform_8(%arg0: i32) -> (i32, i32, i32) {
    %c0_i32 = arith.constant 0 : i32
    %c0_i32_0 = arith.constant 0 : i32
    %c0_i32_1 = arith.constant 0 : i32
    return %arg0, %c0_i32, %c0_i32_0 : i32, i32, i32
  }
  func.func @transform_9(%arg0: i32) -> (i32, i32, i32) {
    %c0_i32 = arith.constant 0 : i32
    %c0_i32_0 = arith.constant 0 : i32
    %c0_i32_1 = arith.constant 0 : i32
    return %arg0, %c0_i32, %c0_i32_0 : i32, i32, i32
  }
  func.func @transform_10(%arg0: i32) -> (i32, i32, i32) {
    %c0_i32 = arith.constant 0 : i32
    %c0_i32_0 = arith.constant 0 : i32
    %c0_i32_1 = arith.constant 0 : i32
    return %arg0, %c0_i32, %c0_i32_0 : i32, i32, i32
  }
  func.func @transform_11(%arg0: i32) -> (i32, i32, i32) {
    %c0_i32 = arith.constant 0 : i32
    %c0_i32_0 = arith.constant 0 : i32
    %c0_i32_1 = arith.constant 0 : i32
    return %arg0, %c0_i32, %c0_i32_0 : i32, i32, i32
  }
  func.func @transform_12(%arg0: i32) -> (i32, i32, i32) {
    %c0_i32 = arith.constant 0 : i32
    %c0_i32_0 = arith.constant 0 : i32
    %c0_i32_1 = arith.constant 0 : i32
    return %arg0, %c0_i32, %c0_i32_0 : i32, i32, i32
  }
  func.func @transform_13(%arg0: i32) -> (i32, i32, i32) {
    %c0_i32 = arith.constant 0 : i32
    %c0_i32_0 = arith.constant 0 : i32
    %c0_i32_1 = arith.constant 0 : i32
    return %arg0, %c0_i32, %c0_i32_0 : i32, i32, i32
  }
  func.func @transform_14(%arg0: i32) -> (i32, i32, i32) {
    %c0_i32 = arith.constant 0 : i32
    %c0_i32_0 = arith.constant 0 : i32
    %c0_i32_1 = arith.constant 0 : i32
    return %arg0, %c0_i32, %c0_i32_0 : i32, i32, i32
  }
  func.func @transform_15(%arg0: i32) -> (i32, i32) {
    %c0_i32 = arith.constant 0 : i32
    %c0_i32_0 = arith.constant 0 : i32
    %c0_i32_1 = arith.constant 0 : i32
    return %c0_i32, %c0_i32_0 : i32, i32
  }
  func.func @transform_16(%arg0: i32) -> (i32, i32) {
    %c0_i32 = arith.constant 0 : i32
    %c0_i32_0 = arith.constant 0 : i32
    %c0_i32_1 = arith.constant 0 : i32
    return %c0_i32, %c0_i32_0 : i32, i32
  }
  func.func @transform_17(%arg0: i32) -> (i32, i32, i32) {
    %c0_i32 = arith.constant 0 : i32
    %c0_i32_0 = arith.constant 0 : i32
    %c0_i32_1 = arith.constant 0 : i32
    %c0_i32_2 = arith.constant 0 : i32
    return %c0_i32, %c0_i32_0, %c0_i32_1 : i32, i32, i32
  }
  func.func @transform_18(%arg0: i32) -> (i32, i32) {
    %c0_i32 = arith.constant 0 : i32
    %c0_i32_0 = arith.constant 0 : i32
    %c0_i32_1 = arith.constant 0 : i32
    return %c0_i32, %c0_i32_0 : i32, i32
  }
}

</mosaic_0001>

<bundles_post_ra>
// kernel: tpu_custom_call.1
= control target key start
LH: loop header
LB: loop body
LE: loop exit
PB: predicated region body
PF: predicated region fallthrough
CT: control target
= control target key end

     0   :  { %s5586_s0 = inlined_call_operand.hbm [shape: f32[2,8,32], index: 0, kind: input, shape index: {}]   ;;  %s5587_s1 = inlined_call_operand.vmem [shape: f32[1,32], index: 1, kind: input, shape index: {}]   ;;  %s5588_s2 = inlined_call_operand.hbm [shape: f32[1,32], index: 2, kind: input, shape index: {}]   ;;  %s5589_s3 = inlined_call_operand.vmem [shape: bf16[2,32,96], index: 3, kind: input, shape index: {}]   ;;  %s5590_s4 = inlined_call_operand.hbm [shape: f32[2,1,96], index: 4, kind: input, shape index: {}]   ;;  %s5591_s5 = inlined_call_operand.vmem [shape: bf16[2,32,32], index: 5, kind: input, shape index: {}]   ;;  %s5592_s6 = inlined_call_operand.hbm [shape: f32[2,1,32], index: 6, kind: input, shape index: {}]   ;;  %s5593_s7 = inlined_call_operand.hbm [shape: f32[2,1,32], index: 7, kind: input, shape index: {}]   ;;  %s5594_s8 = inlined_call_operand.hbm [shape: f32[2,1,32], index: 8, kind: input, shape index: {}]   ;;  %s5595_s9 = inlined_call_operand.vmem [shape: bf16[2,32,64], index: 9, kind: input, shape index: {}]   ;;  %s5596_s10 = inlined_call_operand.hbm [shape: f32[2,1,64], index: 10, kind: input, shape index: {}]   ;;  %s5597_s11 = inlined_call_operand.vmem [shape: bf16[2,64,32], index: 11, kind: input, shape index: {}]   ;;  %s5598_s12 = inlined_call_operand.hbm [shape: f32[2,1,32], index: 12, kind: input, shape index: {}]   ;;  %s5599_s13 = inlined_call_operand.hbm [shape: f32[2,1,32], index: 13, kind: input, shape index: {}]   ;;  %s5600_s14 = inlined_call_operand.vmem [shape: f32[2,1,32], index: 14, kind: input, shape index: {}]   ;;  %s5601_s15 = inlined_call_operand.vmem [shape: bf16[32,32], index: 15, kind: input, shape index: {}]   ;;  %s5602_s16 = inlined_call_operand.vmem [shape: f32[1,32], index: 16, kind: input, shape index: {}]   ;;  %s5603_s17 = inlined_call_operand.hbm [shape: f32[2,8,32], index: 17, kind: output, shape index: {0}]   ;;  %s5604_s18 = inlined_call_operand.hbm [shape: f32[2,32], index: 18, kind: output, shape index: {1}]  }
   0x1   :  { %5623 = sst [smem:[#allocation25_spill]] %s5586_s0 }
   0x2   :  { %5624 = sst [smem:[#allocation26_spill]] %s5587_s1 }
   0x3   :  { %5625 = sst [smem:[#allocation27_spill]] %s5588_s2 }
   0x4   :  { %5626 = sst [smem:[#allocation28_spill]] %s5589_s3 }
   0x5   :  { %5627 = sst [smem:[#allocation29_spill]] %s5590_s4 }
   0x6   :  { %5628 = sst [smem:[#allocation30_spill]] %s5591_s5 }
   0x7   :  { %5629 = sst [smem:[#allocation31_spill]] %s5592_s6 }
   0x8   :  { %5630 = sst [smem:[#allocation32_spill]] %s5593_s7 }
   0x9   :  { %5631 = sst [smem:[#allocation33_spill]] %s5594_s8 }
   0xa   :  { %5632 = sst [smem:[#allocation34_spill]] %s5595_s9 }
   0xb   :  { %5633 = sst [smem:[#allocation35_spill]] %s5597_s11 }
   0xc   :  { %5634 = sst [smem:[#allocation36_spill]] %s5600_s14 }
   0xd   :  { %5635 = sst [smem:[#allocation37_spill]] %s5601_s15 }
   0xe   :  { %5636 = sst [smem:[#allocation38_spill]] %s5602_s16 }
   0xf   :  { %5637 = sst [smem:[#allocation39_spill]] %s5603_s17 }
  0x10   :  { %5638 = sst [smem:[#allocation40_spill]] %s5604_s18 }
  0x11   :  { %24 = vsyncpa [#allocation3], 0 }
  0x12   :  { %25 = vsyncpa [#allocation6], 0 }
  0x13   :  { %26 = vsyncpa [#allocation4], 0 }
  0x14   :  { %27 = vsyncpa [#allocation16], 0  ;;  %s4698_s27 = smov 0   ;;  %s4700_s28 = smov 0  }
  0x15   :  { %s4702_s29 = smov 0   ;;  %s4704_s30 = smov 0  }
  0x16 LB: > { %5639 = sst [smem:[#allocation22_spill]] %s4569_s29  ;;  %s4717_s0 = sadd.s32 4294967295, %s4573_s30   ;;  %s4573_s30 = sphi %s4704_s30, %s5684_s30   ;;  %s4569_s29 = sphi %s4702_s29, %s5686_s29   ;;  %s4565_s28 = sphi %s4700_s28, %s5688_s28   ;;  %s4561_s27 = sphi %s4698_s27, %s5687_s27  }
  0x17   : > { %s4720_s19 = sadd.s32 1, %s4573_s30   ;;  %s129_s20 = sadd.s32 1, %s4569_s29 }
  0x18   : > { %5640 = sst [smem:[#allocation23_spill]] %s4720_s19  ;;  %s126_s1 = ssub.s32 %s4573_s30, %s4720_s19 }
  0x19   : > { %p127_p0 = scmp.eq.s32.totalorder %s126_s1, 0  ;;  %p136_p1 = scmp.ne.s32.totalorder %s4569_s29, %s4565_s28 }
  0x1a   : > { %p137_p2 = scmp.eq.s32.totalorder %s4573_s30, 0  ;;  %p142_p3 = scmp.ne.s32.totalorder %s4565_s28, %s4561_s27 }
  0x1b   : > { %s4730_s21 = scalar_select %p127_p0, %s4569_s29, %s129_s20  }
  0x1c   : > { %p4732_p4 = por %p137_p2, %p136_p1  ;;  %p5613_p5 = scmp.eq.s32.totalorder %s4717_s0, 0 }
  0x1d   : > { %5641 = sst [smem:[#allocation24_spill]] %s4730_s21  ;;  %p3722_p6 = scmp.ge.s32.totalorder %s4573_s30, 1 }
  0x1e   : > { %p497_p7 = scmp.lt.s32.totalorder %s4573_s30, 3  ;;  %p4741_p8 = por %p5613_p5, %p142_p3 }
  0x1f   : > { %s4575_s24 = smov [#allocation2]   ;;  %p4066_p13 = scmp.lt.s32.totalorder %s4573_s30, 2 }
  0x20   : > { %s5643_s2 = scalar_select %p4741_p8, 1, 0 }
  0x21   : > { %p4746_p10 = pnand %p3722_p6, %p497_p7  ;;  %s509_s25 = sshll.u32 %s4575_s24, 4  ;;  %s510_s25 = int_to_ptr.vmem [resolvable:$true] %s509_s25 }
  0x22   : > { %s551_s27 = sand.u32 1, %s4573_s30   ;;  %s4761_s1 = sand.u32 1, %s4569_s29  }
  0x23   : > { %s5644_s23 = scalar_select %p4746_p10, 1, 0 }
  0x24   : > { %p4035_p11 = pneg %p4746_p10  ;;  %p4765_p0 = pnand %p4066_p13, %p4732_p4 }
  0x25   : > { %s5647_s19 = sld [smem:[#allocation25_spill]] }
  0x26   : > { %p4754_p12 = pnand %p4035_p11, %p5613_p5 }
  0x27   : > { %s5646_s20 = scalar_select %p4765_p0, 1, 0 }
  0x28   : > { %s5645_s26 = scalar_select %p4754_p12, 1, 0 }
  0x29   : > { %p5617_p2 = pneg %p4754_p12 }
  0x2b   : > { %s4205_s18 = scalar_lea.hbm %s5647_s19, 256 }
  0x2c   : > { %p4206_p1 = scmp.ne.s32.totalorder %s5647_s19, %s4205_s18  ;;  %p4212_p4 = scmp.lt.u32.totalorder %s4205_s18, %s5647_s19 }
  0x2e   : > { %p4208_p3 = pnand %p5617_p2, %p4206_p1 }
  0x30   : > { %p4209_p6 = pneg %p4208_p3 }
  0x32   : > { %p4214_p7 = pnand %p4212_p4, %p4209_p6 }
  0x34   : > { %4217 = shalt.err (!%p4214_p7)
}
  0x35   : > { %s4218_s15 = scalar_lea.vmem %s510_s25, 256  ;;  %p4226_p5 = scmp.lt.s32.totalorder %s510_s25, %s510_s25 }
  0x36   : > { %p4219_p11 = scmp.ne.s32.totalorder %s510_s25, %s4218_s15  ;;  %p4227_p8 = scmp.lt.s32.totalorder %s4218_s15, %s4218_s15 }
  0x38   : > { %p4221_p13 = pnand %p4219_p11, %p5617_p2  ;;  %p4228_p10 = por %p4227_p8, %p4226_p5 }
  0x3a   : > { %p4222_p9 = pneg %p4221_p13 }
  0x3c   : > { %p4229_p0 = pnand %p4228_p10, %p4222_p9 }
  0x3e   : > { %4232 = shalt.err (!%p4229_p0)
}
  0x3f   : > { %s4576_s16 = smov 128   ;;  %s4577_s17 = smov 8  }
  0x40   : > { %4038 = dma.hbm_to_vmem [thread:$0]  (!%p4754_p12), %s5647_s19, 256, %s510_s25, [#allocation3], %s4576_s16, %s4576_s16, %s4577_s17  }
  0x41   : > { %s4792_s21 = sshll.u32 %s4573_s30, 4  ;;  %s5648_s4 = sld [smem:[#allocation29_spill]] }
  0x42   : > { %s554_s14 = scalar_lea.vmem [#allocation7], %s4761_s1  ;;  %s4803_s9 = scalar_lea.sflag [#allocation3], %s551_s27 }
  0x43   : > { %s561_s11 = sshll.u32 %s554_s14, 4  ;;  %p5649_p8 = scmp.ne.s32.totalorder %s5646_s20, 0  ;;  %s4801_s11 = int_to_ptr.vmem [resolvable:$true] %s561_s11 }
  0x45   : > { %p4809_p9 = pneg %p5649_p8 }
  0x47   : > { %s4798_s15 = scalar_lea.hbm %s5648_s4, %s4792_s21  ;;  %s4238_s17 = scalar_lea.hbm %s5648_s4, 32 }
  0x48   : > { %s4233_s18 = scalar_lea.hbm %s4798_s15, 16  ;;  %p4239_p1 = scmp.lt.u32.totalorder %s4798_s15, %s5648_s4 }
  0x49   : > { %p4234_p5 = scmp.ne.s32.totalorder %s4798_s15, %s4233_s18  ;;  %p4240_p3 = scmp.lt.u32.totalorder %s4238_s17, %s4233_s18 }
  0x4a   : > { %s5650_s30 = scalar_select %p4809_p9, 1, 0 }
  0x4b   : > { %p4236_p10 = pnand %p4809_p9, %p4234_p5  ;;  %p4241_p6 = por %p4240_p3, %p4239_p1 }
  0x4c   : > { %p4242_p4 = scmp.lt.u32.totalorder %s4233_s18, %s4798_s15 }
  0x4d   : > { %p4237_p0 = pneg %p4236_p10 }
  0x4e   : > { %p4243_p7 = por %p4242_p4, %p4241_p6 }
  0x50   : > { %p4244_p11 = pnand %p4243_p7, %p4237_p0 }
  0x52   : > { %4247 = shalt.err (!%p4244_p11)
}
  0x53   : > { %s4248_s27 = scalar_lea.vmem %s4801_s11, 16  ;;  %s4578_s24 = smov [#allocation7]  }
  0x54   : > { %p4249_p13 = scmp.ne.s32.totalorder %s4801_s11, %s4248_s27  ;;  %s4253_s22 = sshll.u32 %s4578_s24, 4  ;;  %s4254_s22 = int_to_ptr.vmem [resolvable:$false] %s4253_s22 }
  0x55   : > { %s4255_s25 = scalar_lea.vmem %s4254_s22, 32  ;;  %p4256_p2 = scmp.lt.s32.totalorder %s4801_s11, %s4254_s22 }
  0x56   : > { %p4251_p5 = pnand %p4249_p13, %p4809_p9  ;;  %p4257_p12 = scmp.lt.s32.totalorder %s4255_s25, %s4248_s27 }
  0x58   : > { %p4252_p10 = pneg %p4251_p5  ;;  %p4258_p1 = por %p4257_p12, %p4256_p2 }
  0x5a   : > { %p4259_p3 = pnand %p4258_p1, %p4252_p10 }
  0x5c   : > { %4262 = shalt.err (!%p4259_p3)
}
  0x5d   : > { %4045 = dma.hbm_to_vmem [thread:$0]  (!%p5649_p8), %s4798_s15, 16, %s4801_s11, %s4803_s9  }
  0x5e   : > { %s5651_s6 = sld [smem:[#allocation31_spill]]  ;;  %s579_s14 = scalar_lea.vmem [#allocation8], %s4761_s1 }
  0x5f   : > { %s586_s29 = sshll.u32 %s579_s14, 4  ;;  %s587_s29 = int_to_ptr.vmem [resolvable:$true] %s586_s29 }
  0x64   : > { %s4837_s17 = scalar_lea.hbm %s5651_s6, %s4792_s21  ;;  %s4268_s11 = scalar_lea.hbm %s5651_s6, 32 }
  0x65   : > { %s4263_s27 = scalar_lea.hbm %s4837_s17, 16  ;;  %p4269_p6 = scmp.lt.u32.totalorder %s4837_s17, %s5651_s6 }
  0x66   : > { %p4264_p12 = scmp.ne.s32.totalorder %s4837_s17, %s4263_s27  ;;  %p4270_p4 = scmp.lt.u32.totalorder %s4268_s11, %s4263_s27 }
  0x67   : > { %p4272_p11 = scmp.lt.u32.totalorder %s4263_s27, %s4837_s17 }
  0x68   : > { %p4266_p2 = pnand %p4264_p12, %p4809_p9  ;;  %p4271_p7 = por %p4270_p4, %p4269_p6 }
  0x6a   : > { %p4267_p0 = pneg %p4266_p2  ;;  %p4273_p13 = por %p4272_p11, %p4271_p7 }
  0x6c   : > { %p4274_p5 = pnand %p4273_p13, %p4267_p0 }
  0x6e   : > { %4277 = shalt.err (!%p4274_p5)
}
  0x6f   : > { %s4278_s18 = scalar_lea.vmem %s587_s29, 16  ;;  %s4579_s16 = smov [#allocation8]  }
  0x70   : > { %p4279_p10 = scmp.ne.s32.totalorder %s587_s29, %s4278_s18  ;;  %s4283_s14 = sshll.u32 %s4579_s16, 4  ;;  %s4284_s14 = int_to_ptr.vmem [resolvable:$false] %s4283_s14 }
  0x71   : > { %s4285_s24 = scalar_lea.vmem %s4284_s14, 32  ;;  %p4286_p12 = scmp.lt.s32.totalorder %s587_s29, %s4284_s14 }
  0x72   : > { %p4281_p1 = pnand %p4279_p10, %p4809_p9  ;;  %p4287_p2 = scmp.lt.s32.totalorder %s4285_s24, %s4278_s18 }
  0x74   : > { %p4282_p3 = pneg %p4281_p1  ;;  %p4288_p8 = por %p4287_p2, %p4286_p12 }
  0x76   : > { %p4289_p4 = pnand %p4288_p8, %p4282_p3 }
  0x78   : > { %4292 = shalt.err (!%p4289_p4)
}
  0x79   : > { %p5652_p6 = scmp.ne.s32.totalorder %s5646_s20, 0  ;;  %s5653_s7 = sld [smem:[#allocation32_spill]] }
  0x7a   : > { %s596_s15 = scalar_lea.vmem [#allocation9], %s4761_s1 }
  0x7b   : > { %4048 = dma.hbm_to_vmem [thread:$0]  (!%p5652_p6), %s4837_s17, 16, %s587_s29, %s4803_s9  }
  0x7c   : > { %s603_s25 = sshll.u32 %s596_s15, 4  ;;  %s604_s25 = int_to_ptr.vmem [resolvable:$true] %s603_s25 }
  0x7f   : > { %s4862_s11 = scalar_lea.hbm %s5653_s7, %s4792_s21  ;;  %s4298_s17 = scalar_lea.hbm %s5653_s7, 32 }
  0x80   : > { %s4293_s18 = scalar_lea.hbm %s4862_s11, 16  ;;  %p4299_p11 = scmp.lt.u32.totalorder %s4862_s11, %s5653_s7 }
  0x81   : > { %p4294_p8 = scmp.ne.s32.totalorder %s4862_s11, %s4293_s18  ;;  %p4300_p13 = scmp.lt.u32.totalorder %s4298_s17, %s4293_s18 }
  0x82   : > { %p4302_p10 = scmp.lt.u32.totalorder %s4293_s18, %s4862_s11 }
  0x83   : > { %p4296_p0 = pnand %p4294_p8, %p4809_p9  ;;  %p4301_p5 = por %p4300_p13, %p4299_p11 }
  0x85   : > { %p4297_p7 = pneg %p4296_p0  ;;  %p4303_p1 = por %p4302_p10, %p4301_p5 }
  0x87   : > { %p4304_p3 = pnand %p4303_p1, %p4297_p7 }
  0x89   : > { %4307 = shalt.err (!%p4304_p3)
}
  0x8a   : > { %s4308_s27 = scalar_lea.vmem %s604_s25, 16  ;;  %s4580_s22 = smov [#allocation9]  }
  0x8b   : > { %p4309_p12 = scmp.ne.s32.totalorder %s604_s25, %s4308_s27  ;;  %s4313_s15 = sshll.u32 %s4580_s22, 4  ;;  %s4314_s15 = int_to_ptr.vmem [resolvable:$false] %s4313_s15 }
  0x8c   : > { %s4315_s16 = scalar_lea.vmem %s4314_s15, 32  ;;  %p4316_p8 = scmp.lt.s32.totalorder %s604_s25, %s4314_s15 }
  0x8d   : > { %p4311_p2 = pnand %p4309_p12, %p4809_p9  ;;  %p4317_p0 = scmp.lt.s32.totalorder %s4315_s16, %s4308_s27 }
  0x8f   : > { %p4312_p4 = pneg %p4311_p2  ;;  %p4318_p6 = por %p4317_p0, %p4316_p8 }
  0x91   : > { %p4319_p11 = pnand %p4318_p6, %p4312_p4 }
  0x93   : > { %4322 = shalt.err (!%p4319_p11)
}
  0x94   : > { %p5654_p13 = scmp.ne.s32.totalorder %s5646_s20, 0  ;;  %s5655_s8 = sld [smem:[#allocation33_spill]] }
  0x95   : > { %s613_s29 = scalar_lea.vmem [#allocation10], %s4761_s1 }
  0x96   : > { %4051 = dma.hbm_to_vmem [thread:$0]  (!%p5654_p13), %s4862_s11, 16, %s604_s25, %s4803_s9  }
  0x97   : > { %s620_s24 = sshll.u32 %s613_s29, 4  ;;  %s621_s24 = int_to_ptr.vmem [resolvable:$true] %s620_s24 }
  0x9a   : > { %s4887_s17 = scalar_lea.hbm %s5655_s8, %s4792_s21  ;;  %s4328_s11 = scalar_lea.hbm %s5655_s8, 32 }
  0x9b   : > { %s4323_s27 = scalar_lea.hbm %s4887_s17, 16  ;;  %p4329_p10 = scmp.lt.u32.totalorder %s4887_s17, %s5655_s8 }
  0x9c   : > { %p4324_p6 = scmp.ne.s32.totalorder %s4887_s17, %s4323_s27  ;;  %p4330_p1 = scmp.lt.u32.totalorder %s4328_s11, %s4323_s27 }
  0x9d   : > { %p4332_p12 = scmp.lt.u32.totalorder %s4323_s27, %s4887_s17 }
  0x9e   : > { %p4326_p7 = pnand %p4324_p6, %p4809_p9  ;;  %p4331_p3 = por %p4330_p1, %p4329_p10 }
  0xa0   : > { %p4327_p5 = pneg %p4326_p7  ;;  %p4333_p2 = por %p4332_p12, %p4331_p3 }
  0xa2   : > { %p4334_p4 = pnand %p4333_p2, %p4327_p5 }
  0xa4   : > { %4337 = shalt.err (!%p4334_p4)
}
  0xa5   : > { %s4338_s18 = scalar_lea.vmem %s621_s24, 16  ;;  %s4581_s14 = smov [#allocation10]  }
  0xa6   : > { %p4339_p8 = scmp.ne.s32.totalorder %s621_s24, %s4338_s18  ;;  %s4343_s29 = sshll.u32 %s4581_s14, 4  ;;  %s4344_s29 = int_to_ptr.vmem [resolvable:$false] %s4343_s29 }
  0xa7   : > { %s4345_s22 = scalar_lea.vmem %s4344_s29, 32  ;;  %p4346_p6 = scmp.lt.s32.totalorder %s621_s24, %s4344_s29 }
  0xa8   : > { %p4341_p0 = pnand %p4339_p8, %p4809_p9  ;;  %p4347_p7 = scmp.lt.s32.totalorder %s4345_s22, %s4338_s18 }
  0xaa   : > { %p4342_p11 = pneg %p4341_p0  ;;  %p4348_p13 = por %p4347_p7, %p4346_p6 }
  0xac   : > { %p4349_p1 = pnand %p4348_p13, %p4342_p11 }
  0xae   : > { %4352 = shalt.err (!%p4349_p1)
}
  0xaf   : > { %p5656_p10 = scmp.ne.s32.totalorder %s5646_s20, 0  ;;  %s4912_s11 = scalar_lea.hbm %s5596_s10, %s4792_s21 }
  0xb0   : > { %s638_s25 = scalar_lea.vmem [#allocation11], %s4761_s1  ;;  %s4353_s18 = scalar_lea.hbm %s4912_s11, 16 }
  0xb1   : > { %4054 = dma.hbm_to_vmem [thread:$0]  (!%p5656_p10), %s4887_s17, 16, %s621_s24, %s4803_s9  }
  0xb2   : > { %s645_s16 = sshll.u32 %s638_s25, 4  ;;  %p4354_p13 = scmp.ne.s32.totalorder %s4912_s11, %s4353_s18  ;;  %s646_s16 = int_to_ptr.vmem [resolvable:$true] %s645_s16 }
  0xb3   : > { %s4358_s17 = scalar_lea.hbm %s5596_s10, 32  ;;  %p4359_p12 = scmp.lt.u32.totalorder %s4912_s11, %s5596_s10 }
  0xb4   : > { %p4356_p5 = pnand %p4354_p13, %p4809_p9  ;;  %p4360_p2 = scmp.lt.u32.totalorder %s4358_s17, %s4353_s18 }
  0xb5   : > { %p4362_p8 = scmp.lt.u32.totalorder %s4353_s18, %s4912_s11 }
  0xb6   : > { %p4357_p3 = pneg %p4356_p5  ;;  %p4361_p4 = por %p4360_p2, %p4359_p12 }
  0xb8   : > { %p4363_p0 = por %p4362_p8, %p4361_p4 }
  0xba   : > { %p4364_p11 = pnand %p4363_p0, %p4357_p3 }
  0xbc   : > { %4367 = shalt.err (!%p4364_p11)
}
  0xbd   : > { %s4368_s27 = scalar_lea.vmem %s646_s16, 16  ;;  %s4582_s15 = smov [#allocation11]  }
  0xbe   : > { %p4369_p6 = scmp.ne.s32.totalorder %s646_s16, %s4368_s27  ;;  %s4373_s25 = sshll.u32 %s4582_s15, 4  ;;  %s4374_s25 = int_to_ptr.vmem [resolvable:$false] %s4373_s25 }
  0xbf   : > { %s4375_s14 = scalar_lea.vmem %s4374_s25, 32  ;;  %p4376_p13 = scmp.lt.s32.totalorder %s646_s16, %s4374_s25 }
  0xc0   : > { %p4371_p7 = pnand %p4369_p6, %p4809_p9  ;;  %p4377_p5 = scmp.lt.s32.totalorder %s4375_s14, %s4368_s27 }
  0xc2   : > { %p4372_p1 = pneg %p4371_p7  ;;  %p4378_p10 = por %p4377_p5, %p4376_p13 }
  0xc4   : > { %p4379_p2 = pnand %p4378_p10, %p4372_p1 }
  0xc6   : > { %4382 = shalt.err (!%p4379_p2)
}
  0xc7   : > { %p5657_p12 = scmp.ne.s32.totalorder %s5646_s20, 0  ;;  %s4937_s17 = scalar_lea.hbm %s5598_s12, %s4792_s21 }
  0xc8   : > { %s663_s24 = scalar_lea.vmem [#allocation12], %s4761_s1  ;;  %s4383_s27 = scalar_lea.hbm %s4937_s17, 16 }
  0xc9   : > { %4057 = dma.hbm_to_vmem [thread:$0]  (!%p5657_p12), %s4912_s11, 16, %s646_s16, %s4803_s9  }
  0xca   : > { %s670_s22 = sshll.u32 %s663_s24, 4  ;;  %p4384_p10 = scmp.ne.s32.totalorder %s4937_s17, %s4383_s27  ;;  %s671_s22 = int_to_ptr.vmem [resolvable:$true] %s670_s22 }
  0xcb   : > { %s4388_s11 = scalar_lea.hbm %s5598_s12, 32  ;;  %p4389_p8 = scmp.lt.u32.totalorder %s4937_s17, %s5598_s12 }
  0xcc   : > { %p4386_p3 = pnand %p4384_p10, %p4809_p9  ;;  %p4390_p0 = scmp.lt.u32.totalorder %s4388_s11, %s4383_s27 }
  0xcd   : > { %p4392_p6 = scmp.lt.u32.totalorder %s4383_s27, %s4937_s17 }
  0xce   : > { %p4387_p4 = pneg %p4386_p3  ;;  %p4391_p11 = por %p4390_p0, %p4389_p8 }
  0xd0   : > { %p4393_p7 = por %p4392_p6, %p4391_p11 }
  0xd2   : > { %p4394_p1 = pnand %p4393_p7, %p4387_p4 }
  0xd4   : > { %4397 = shalt.err (!%p4394_p1)
}
  0xd5   : > { %s4398_s18 = scalar_lea.vmem %s671_s22, 16  ;;  %s4583_s29 = smov [#allocation12]  }
  0xd6   : > { %p4399_p13 = scmp.ne.s32.totalorder %s671_s22, %s4398_s18  ;;  %s4403_s24 = sshll.u32 %s4583_s29, 4  ;;  %s4404_s24 = int_to_ptr.vmem [resolvable:$false] %s4403_s24 }
  0xd7   : > { %s4405_s15 = scalar_lea.vmem %s4404_s24, 32  ;;  %p4406_p10 = scmp.lt.s32.totalorder %s671_s22, %s4404_s24 }
  0xd8   : > { %p4401_p5 = pnand %p4399_p13, %p4809_p9  ;;  %p4407_p3 = scmp.lt.s32.totalorder %s4405_s15, %s4398_s18 }
  0xda   : > { %p4402_p2 = pneg %p4401_p5  ;;  %p4408_p12 = por %p4407_p3, %p4406_p10 }
  0xdc   : > { %p4409_p0 = pnand %p4408_p12, %p4402_p2 }
  0xde   : > { %4412 = shalt.err (!%p4409_p0)
}
  0xdf   : > { %p5658_p8 = scmp.ne.s32.totalorder %s5646_s20, 0  ;;  %s4584_s27 = smov [#allocation5]  }
  0xe0   : > { %s526_s25 = sshll.u32 %s4584_s27, 4  ;;  %s4962_s14 = scalar_lea.hbm %s5599_s13, %s4792_s21  ;;  %s527_s25 = int_to_ptr.vmem [resolvable:$true] %s526_s25 }
  0xe1   : > { %4060 = dma.hbm_to_vmem [thread:$0]  (!%p5658_p8), %s4937_s17, 16, %s671_s22, %s4803_s9  }
  0xe2   : > { %s5659_s24 = sld [smem:[#allocation27_spill]]  ;;  %p5660_p4 = scmp.ne.s32.totalorder %s5645_s26, 0 }
  0xe4   : > { %p5661_p11 = pneg %p5660_p4 }
  0xe8   : > { %s4413_s15 = scalar_lea.hbm %s5659_s24, 16 }
  0xe9   : > { %p4414_p12 = scmp.ne.s32.totalorder %s5659_s24, %s4413_s15  ;;  %p4420_p1 = scmp.lt.u32.totalorder %s4413_s15, %s5659_s24 }
  0xeb   : > { %p4416_p6 = pnand %p4414_p12, %p5661_p11 }
  0xed   : > { %p4417_p7 = pneg %p4416_p6 }
  0xef   : > { %p4422_p13 = pnand %p4420_p1, %p4417_p7 }
  0xf1   : > { %4425 = shalt.err (!%p4422_p13)
}
  0xf2   : > { %s4426_s21 = scalar_lea.vmem %s527_s25, 16  ;;  %p5662_p2 = pmov %p5661_p11 }
  0xf3   : > { %p4427_p5 = scmp.ne.s32.totalorder %s527_s25, %s4426_s21  ;;  %s4433_s27 = scalar_lea.vmem %s527_s25, 32 }
  0xf4   : > { %p4434_p0 = scmp.lt.s32.totalorder %s527_s25, %s527_s25  ;;  %p4435_p8 = scmp.lt.s32.totalorder %s4433_s27, %s4426_s21 }
  0xf5   : > { %p4429_p10 = pnand %p4427_p5, %p5662_p2 }
  0xf6   : > { %p4436_p9 = por %p4435_p8, %p4434_p0 }
  0xf7   : > { %p4430_p3 = pneg %p4429_p10 }
  0xf9   : > { %p4437_p11 = pnand %p4436_p9, %p4430_p3 }
  0xfb   : > { %4440 = shalt.err (!%p4437_p11)
}
  0xfc   : > { %4041 = dma.hbm_to_vmem [thread:$0]  (!%p5660_p4), %s5659_s24, 16, %s527_s25, [#allocation6]  }
  0xfd   : > { %s680_s11 = scalar_lea.vmem [#allocation13], %s4761_s1  ;;  %s4441_s29 = scalar_lea.hbm %s4962_s14, 16 }
  0xfe   : > { %s687_s16 = sshll.u32 %s680_s11, 4  ;;  %p4442_p12 = scmp.ne.s32.totalorder %s4962_s14, %s4441_s29  ;;  %s688_s16 = int_to_ptr.vmem [resolvable:$true] %s687_s16 }
  0xff   : > { %p5663_p8 = scmp.ne.s32.totalorder %s5650_s30, 0  ;;  %s4446_s15 = scalar_lea.hbm %s5599_s13, 32 }
 0x100   : > { %p4447_p7 = scmp.lt.u32.totalorder %s4962_s14, %s5599_s13  ;;  %p4448_p1 = scmp.lt.u32.totalorder %s4446_s15, %s4441_s29 }
 0x101   : > { %p4444_p9 = pnand %p4442_p12, %p5663_p8  ;;  %p4450_p5 = scmp.lt.u32.totalorder %s4441_s29, %s4962_s14 }
 0x102   : > { %p4449_p13 = por %p4448_p1, %p4447_p7 }
 0x103   : > { %p4445_p6 = pneg %p4444_p9 }
 0x104   : > { %p4451_p4 = por %p4450_p5, %p4449_p13 }
 0x106   : > { %p4452_p2 = pnand %p4451_p4, %p4445_p6 }
 0x108   : > { %4455 = shalt.err (!%p4452_p2)
}
 0x109   : > { %s4456_s1 = scalar_lea.vmem %s688_s16, 16  ;;  %s4585_s25 = smov [#allocation13]  }
 0x10a   : > { %p4457_p10 = scmp.ne.s32.totalorder %s688_s16, %s4456_s1  ;;  %s4461_s21 = sshll.u32 %s4585_s25, 4  ;;  %s4462_s21 = int_to_ptr.vmem [resolvable:$false] %s4461_s21 }
 0x10b   : > { %s4463_s27 = scalar_lea.vmem %s4462_s21, 32  ;;  %p4464_p11 = scmp.lt.s32.totalorder %s688_s16, %s4462_s21 }
 0x10c   : > { %p4459_p3 = pnand %p4457_p10, %p5663_p8  ;;  %p4465_p12 = scmp.lt.s32.totalorder %s4463_s27, %s4456_s1 }
 0x10e   : > { %p4460_p0 = pneg %p4459_p3  ;;  %p4466_p9 = por %p4465_p12, %p4464_p11 }
 0x110   : > { %p4467_p1 = pnand %p4466_p9, %p4460_p0 }
 0x112   : > { %4470 = shalt.err (!%p4467_p1)
}
 0x113   : > { %p5664_p7 = scmp.ne.s32.totalorder %s5646_s20, 0  ;;  %p5665_p6 = scmp.ne.s32.totalorder %s5644_s23, 0 }
 0x114   : > { %p5666_p8 = scmp.eq.s32.totalorder (!%p5665_p6), %s4717_s0, 0 }
 0x115   : > { %4063 = dma.hbm_to_vmem [thread:$0]  (!%p5664_p7), %s4962_s14, 16, %s688_s16, %s4803_s9  }
 0x116   : > { %702 = sbr.rel (%p5665_p6) target bundleno = 3665 (0xe51), region = 88 }
 0x11d   : > { %4540 = dma.done.wait (%p5666_p8), [#allocation3], 256   ;;  %p5667_p13 = pmov %p5666_p8 }
 0x11e   : > { %p5668_p5 = pmov %p5666_p8 }
 0x11f   : > { %4542 = vsyncadd (%p5667_p13), [#allocation3], 4294967040 }
 0x120   : > { %4544 = dma.done.wait (%p5668_p5), [#allocation6], 16   ;;  %p5669_p4 = pmov %p5668_p5 }
 0x121   : > { %s712_s20 = sand.u32 1, %s4717_s0   ;;  %s5015_s9 = sand.u32 1, %s4565_s28  }
 0x122   : > { %4546 = vsyncadd (%p5669_p4), [#allocation6], 4294967280  ;;  %s713_s23 = scalar_lea.sflag [#allocation3], %s712_s20  ;;  %p5670_p2 = scmp.ne.s32.totalorder %s5643_s2, 0 }
 0x124   : > { %4548 = dma.done.wait (%p5670_p2), %s713_s23, 112  }
 0x125   : > { %4550 = vsyncadd (%p5670_p2), %s713_s23, 4294967184  ;;  %p857_p10 = scmp.lt.s32.totalorder %s4717_s0, 1  ;;  %s5671_s3 = sld [smem:[#allocation28_spill]] }
 0x126   : > { %s5672_s5 = sld [smem:[#allocation30_spill]]  ;;  %s5673_s22 = sld [smem:[#allocation34_spill]] }
 0x127   : > { %s5024_s14 = scalar_select %p857_p10, %s4717_s0, 1 }
 0x128   : > { %s5674_s27 = sld [smem:[#allocation35_spill]]  ;;  %s5675_s11 = sld [smem:[#allocation36_spill]] }
 0x129   : > { %s3812_s4 = sshll.u32 %s5024_s14, 4  ;;  %s3815_s6 = sshll.u32 %s5024_s14, 5 }
 0x12a   : > { %s731_s7 = scalar_lea.vmem [#allocation9], %s5015_s9  ;;  %s739_s8 = scalar_lea.vmem [#allocation10], %s5015_s9 }
 0x12b   : > { %s5031_s2 = scalar_lea.vmem %s5671_s3, %s3812_s4  ;;  %s723_s3 = scalar_lea.vmem [#allocation8], %s5015_s9 }
 0x12c   : > { %s5036_s26 = scalar_lea.vmem %s5672_s5, %s3812_s4  ;;  %s5041_s1 = scalar_lea.vmem %s5673_s22, %s3812_s4 }
 0x12d   : > { %s747_s29 = scalar_lea.vmem [#allocation11], %s5015_s9  ;;  %s755_s18 = scalar_lea.vmem [#allocation12], %s5015_s9 }
 0x12e   : > { %s5046_s20 = scalar_lea.vmem %s5674_s27, %s3815_s6  ;;  %s879_s16 = scalar_lea.vmem %s5675_s11, %s5024_s14 }
 0x12f   : > { %s763_s5 = scalar_lea.vmem [#allocation13], %s5015_s9  ;;  %p5676_p3 = scmp.ne.s32.totalorder %s4717_s0, 0 }
 0x130   : > { %v885_v0 = vld [vmem:[#allocation2] sm:$0xff] (!%p5676_p3)  ;;  %vm889_vm0 = vcmask (!%p5676_p3), 261120   ;;  %v886_v1 = vld [vmem:[#allocation2 + $0x8] sm:$0xff] (!%p5676_p3)  ;;  %s5677_s6 = sld [smem:[#allocation26_spill]] (!%p5676_p3)  ;;  %v3746_v23 = vld [vmem:[#allocation5] ss:$0 sm:$0xff] (!%p5676_p3) }
 0x131   : > { %884 = sbr.rel (%p5676_p3) target bundleno = 623 (0x26f), region = 128  ;;  %v890_v2 = vsel (!%p5676_p3), %vm889_vm0, %v885_v0, 0.0  ;;  %v893_v3 = vsel (!%p5676_p3), %vm889_vm0, %v886_v1, 0.0 }
 0x132   : > { %891 = vadd.xlane.f32.xlu0 (!%p5676_p3), %v890_v2 }
 0x136   : > { %894 = vadd.xlane.f32.xlu0 (!%p5676_p3), %v893_v3  ;;  %v3745_v21 = vld [vmem:[%s5677_s6] ss:$0 sm:$0xff] (!%p5676_p3) }
 0x1bf   : > { %v892_v4 = vpop.xlane.xlu0 %891 }
 0x1c0   : > { %v897_v5 = vmul.f32 0.03125, %v892_v4 }
 0x1c2   : > { %v899_v6 = vsub.f32 %v885_v0, %v897_v5 }
 0x1c3   : > { %v895_v7 = vpop.xlane.xlu0 %894 }
 0x1c4   : > { %v898_v8 = vmul.f32 0.03125, %v895_v7  ;;  %v901_v9 = vmul.f32 %v899_v6, %v899_v6 }
 0x1c6   : > { %v900_v10 = vsub.f32 %v886_v1, %v898_v8  ;;  %v903_v11 = vsel %vm889_vm0, %v901_v9, 0.0 }
 0x1c7   : > { %904 = vadd.xlane.f32.xlu1 %v903_v11 }
 0x1c8   : > { %v902_v12 = vmul.f32 %v900_v10, %v900_v10 }
 0x1ca   : > { %v906_v13 = vsel %vm889_vm0, %v902_v12, 0.0 }
 0x1cb   : > { %907 = vadd.xlane.f32.xlu1 %v906_v13 }
 0x254   : > { %v905_v14 = vpop.xlane.xlu1 %904 }
 0x255   : > { %v909_v15 = vmul.f32 0.03125, %v905_v14 }
 0x257   : > { %v911_v16 = vadd.f32 1e-12, %v909_v15 }
 0x258   : > { %v908_v17 = vpop.xlane.xlu1 %907 }
 0x259   : > { %4126 = vrsqrt.f32 %v911_v16  ;;  %v910_v18 = vmul.f32 0.03125, %v908_v17 }
 0x25b   : > { %v912_v19 = vadd.f32 1e-12, %v910_v18 }
 0x25d   : > { %4128 = vrsqrt.f32 %v912_v19 }
 0x263   : > { %v4127_v20 = vpop.eup %4126 }
 0x264   : > { %v915_v22 = vmul.f32 %v4127_v20, %v899_v6 }
 0x266   : > { %v923_v24 = vmul.f32 %v3745_v21, %v915_v22 }
 0x267   : > { %v4129_v25 = vpop.eup %4128 }
 0x268   : > { %v931_v26 = vadd.f32 %v3746_v23, %v923_v24  ;;  %v916_v27 = vmul.f32 %v4129_v25, %v900_v10 }
 0x26a   : > { %933 = vst.msk [vmem:[#allocation14] sm:$0xff] %vm889_vm0, %v931_v26  ;;  %v924_v28 = vmul.f32 %v3745_v21, %v916_v27 }
 0x26c   : > { %v932_v29 = vadd.f32 %v3746_v23, %v924_v28 }
 0x26e   : > { %934 = vst.msk [vmem:[#allocation14 + $0x8] sm:$0xff] %vm889_vm0, %v932_v29 }
 0x26f PF: > { %v4145_v30 = vld [vmem:[%s5031_s2] sm:$0xff]   ;;  %v4586_v31 = vmov 0.0   ;;  %v4146_v32 = vld [vmem:[%s5031_s2 + $0x8] sm:$0xff]   ;;  %vm4587_vm1 = vmmov 0   ;;  %vm961_vm2 = vcmask 261120   ;;  %s5678_s2 = scalar_lea.vmem [#allocation7], %s5015_s9  ;;  %v1021_v51 = vlaneseq }
 0x270   : > { %3865 = vmatprep.subr.bf16.mxu0 %v4586_v31  ;;  %3873 = vmatprep.subr.bf16.mxu1 %v4586_v31  ;;  %v3747_v36 = vld [vmem:[%s5678_s2] ss:$0 sm:$0xff]  ;;  %s4588_s15 = smov 104   ;;  %s4589_s17 = smov 120   ;;  %v4593_v49 = vmov 1983009808  }
 0x271   : > { %3866 = vmatpush3.bf16.msra.mxu0 %v4145_v30  ;;  %3869 = vmatprep.mubr.msk.bf16.mxu0 %vm4587_vm1, %v4586_v31  ;;  %v935_v33 = vld [vmem:[#allocation14] sm:$0xff]  ;;  %s4590_s22 = smov 112   ;;  %s4591_s25 = smov 96   ;;  %v1019_v50 = vunpack.c.l.s4 %v4593_v49  ;;  %v1022_v53 = vshrl.u32 %v1021_v51, 7  ;;  %v4594_v54 = vmov 1934713408  }
 0x272   : > { %3867 = vmatprep.subr.bf16.mxu0 %v4586_v31  ;;  %3875 = vmatprep.mubr.msk.bf16.mxu1 %vm4587_vm1, %v4586_v31  ;;  %s4592_s21 = smov 64   ;;  %v1051_v55 = vunpack.c.l.s4 %v4594_v54  ;;  %vm1914_vm3 = vcmask 64512   ;;  %vm2382_vm4 = vcmask 1043456   ;;  %s4595_s27 = smov 16   ;;  %vm2897_vm5 = vcmask 130048  }
 0x273   : > { %v1020_v52 = vunpack.c.0.s8 %v1019_v50  ;;  %s4597_s23 = smov 24   ;;  %vm2899_vm6 = vcmask 195584   ;;  %vm3293_vm7 = vcmask 523264   ;;  %p3801_p0 = scmp.ne.s32.totalorder %s4717_s0, 1 }
 0x274   : > { %v1052_v61 = vunpack.c.0.s8 %v1051_v55  ;;  %vm4599_vm8 = vmmov (!%p3801_p0), 0   ;;  %vm3393_vm9 = vcmask (!%p3801_p0), 1040384   ;;  %vm3463_vm10 = vcmask (!%p3801_p0), 254976  }
 0x275   : > { %v936_v34 = vld [vmem:[#allocation14 + $0x8] sm:$0xff]  ;;  %3868 = vmatpush3.bf16.msra.mxu0 %v4146_v32  ;;  %v5110_v57 = vsub.s32 %v1020_v52, %v1022_v53 }
 0x276   : > { %v937_v35 = vpack.c.bf16 %v936_v34, %v935_v33  ;;  %3879 = vmatprep.subr.bf16.mxu0 %v4586_v31  ;;  %v5121_v2 = vsub.s32 %v1052_v61, %v1022_v53 }
 0x278   : > { %3870 = vmatmul.mubr.msk.bf16.vlgmr.msra.gmra.mrb[0].mxu0 %vm961_vm2, %v937_v35 }
 0x279   : > { %3881 = vmatprep.mubr.msk.bf16.mxu0 %vm4587_vm1, %v4586_v31 }
 0x34b   : > { %v999_v37 = vpop.f32.mrb[0].mxu0 }
 0x34c   : > { %v1000_v38 = vadd.f32 %v3747_v36, %v999_v37  ;;  %v3871_v39 = vpop.f32.mrb[1].mxu0 }
 0x34d   : > { %v1002_v40 = vpop.f32.mrb[2].mxu0 }
 0x34e   : > { %1013 = vrot.lane.b32.xlu1 %v1000_v38, %s4588_s15  ;;  %1007 = vrot.lane.b32.xlu0 %v1000_v38, %s4589_s17  ;;  %v3872_v41 = vpop.f32.mrb[3].mxu0  ;;  %v5084_v42 = vadd.f32 %v3747_v36, %v1002_v40 }
 0x352   : > { %1010 = vrot.lane.b32.xlu0 %v1000_v38, %s4590_s22  ;;  %1153 = vrot.lane.b32.xlu1 %v5084_v42, %s4589_s17 }
 0x356   : > { %1156 = vrot.lane.b32.xlu0 %v5084_v42, %s4590_s22  ;;  %1159 = vrot.lane.b32.xlu1 %v5084_v42, %s4588_s15 }
 0x35a   : > { %1306 = vrot.lane.b32.xlu0 %v1000_v38, %s4591_s25 }
 0x3c0   : > { %v5089_v43 = vpop.permute.xlu0 %1007  ;;  %v5091_v44 = vpop.permute.xlu1 %1013 }
 0x3c1   : > { %1308 = vrot.lane.b32.xlu1 %v5089_v43, %s4591_s25  ;;  %v1032_v58 = vcombine.low %v5089_v43, %v5091_v44  ;;  %v1033_v60 = vcombine.high %v5089_v43, %v5091_v44 }
 0x3c3   : > { %v1040_v63 = vrot.slane %v1032_v58, %v5110_v57  ;;  %v1047_v1 = vrot.slane %v1033_v60, %v5110_v57 }
 0x3c4   : > { %v5094_v45 = vpop.permute.xlu0 %1010  ;;  %v5098_v46 = vpop.permute.xlu1 %1153 }
 0x3c5   : > { %1310 = vrot.lane.b32.xlu0 %v5094_v45, %s4591_s25  ;;  %1312 = vrot.lane.b32.xlu1 %v5091_v44, %s4591_s25  ;;  %v1016_v56 = vcombine.low %v1000_v38, %v5094_v45  ;;  %v1017_v59 = vcombine.high %v1000_v38, %v5094_v45 }
 0x3c7   : > { %v1024_v62 = vrot.slane %v1016_v56, %v5110_v57  ;;  %v1031_v0 = vrot.slane %v1017_v59, %v5110_v57 }
 0x3c8   : > { %v5102_v47 = vpop.permute.xlu0 %1156  ;;  %v5104_v48 = vpop.permute.xlu1 %1159 }
 0x3c9   : > { %1454 = vrot.lane.b32.xlu0 %v5084_v42, %s4591_s25  ;;  %1456 = vrot.lane.b32.xlu1 %v5098_v46, %s4591_s25  ;;  %v1048_v3 = vcombine.low %v1024_v62, %v1040_v63  ;;  %v1049_v4 = vcombine.high %v1024_v62, %v1040_v63  ;;  %v1064_v5 = vcombine.low %v1031_v0, %v1047_v1 }
 0x3ca   : > { %v1065_v6 = vcombine.high %v1031_v0, %v1047_v1  ;;  %v1162_v7 = vcombine.low %v5084_v42, %v5102_v47  ;;  %v1178_v8 = vcombine.low %v5098_v46, %v5104_v48  ;;  %v1163_v11 = vcombine.high %v5084_v42, %v5102_v47 }
 0x3cb   : > { %v1056_v9 = vrot.slane %v1048_v3, %v5121_v2  ;;  %v1063_v10 = vrot.slane %v1049_v4, %v5121_v2  ;;  %v1179_v12 = vcombine.high %v5098_v46, %v5104_v48  ;;  %v1072_v13 = vrot.slane %v1064_v5, %v5121_v2 }
 0x3cc   : > { %v1079_v14 = vrot.slane %v1065_v6, %v5121_v2  ;;  %v1170_v15 = vrot.slane %v1162_v7, %v5110_v57  ;;  %v1186_v16 = vrot.slane %v1178_v8, %v5110_v57  ;;  %v1307_v17 = vpop.permute.xlu0 %1306  ;;  %v1177_v21 = vrot.slane %v1163_v11, %v5110_v57 }
 0x3cd   : > { %1458 = vrot.lane.b32.xlu0 %v5102_v47, %s4591_s25  ;;  %1460 = vrot.lane.b32.xlu1 %v5104_v48, %s4591_s25  ;;  %v1084_v19 = vcombine.low %v1056_v9, %v1063_v10  ;;  %v3751_v20 = vcombine.high %v1056_v9, %v1063_v10  ;;  %v1193_v22 = vrot.slane %v1179_v12, %v5110_v57 }
 0x3ce   : > { %v1100_v23 = vcombine.low %v1072_v13, %v1079_v14  ;;  %v3752_v24 = vcombine.high %v1072_v13, %v1079_v14  ;;  %v1194_v25 = vcombine.low %v1170_v15, %v1186_v16  ;;  %v1195_v26 = vcombine.high %v1170_v15, %v1186_v16 }
 0x3cf   : > { %v1210_v34 = vcombine.low %v1177_v21, %v1193_v22  ;;  %v1211_v35 = vcombine.high %v1177_v21, %v1193_v22  ;;  %v5140_v36 = vrot.slane %v1084_v19, %v5110_v57  ;;  %v5143_v37 = vrot.slane %v3751_v20, %v5110_v57 }
 0x3d0   : > { %v5150_v49 = vrot.slane %v1194_v25, %v5121_v2  ;;  %v5153_v50 = vrot.slane %v1195_v26, %v5121_v2  ;;  %v5156_v52 = vrot.slane %v1100_v23, %v5110_v57  ;;  %v5159_v53 = vrot.slane %v3752_v24, %v5110_v57 }
 0x3d1   : > { %1610 = vrot.lane.b32.xlu1 %v1000_v38, %s4592_s21  ;;  %v5162_v60 = vrot.slane %v1210_v34, %v5121_v2  ;;  %v5165_v61 = vrot.slane %v1211_v35, %v5121_v2  ;;  %v1116_v5 = vcombine.low %v5140_v36, %v5143_v37  ;;  %v1117_v6 = vcombine.high %v5140_v36, %v5143_v37 }
 0x3d2   : > { %v1230_v3 = vcombine.low %v5150_v49, %v5153_v50  ;;  %v1132_v7 = vcombine.low %v5156_v52, %v5159_v53 }
 0x433   : > { %v1309_v18 = vpop.permute.xlu1 %1308 }
 0x437   : > { %v1311_v27 = vpop.permute.xlu0 %1310  ;;  %v1313_v28 = vpop.permute.xlu1 %1312 }
 0x438   : > { %v1318_v29 = vcombine.low %v1307_v17, %v1311_v27  ;;  %v1319_v30 = vcombine.high %v1307_v17, %v1311_v27  ;;  %v1334_v32 = vcombine.low %v1309_v18, %v1313_v28  ;;  %v1335_v33 = vcombine.high %v1309_v18, %v1313_v28 }
 0x43a   : > { %v1326_v38 = vrot.slane %v1318_v29, %v5110_v57  ;;  %v1333_v39 = vrot.slane %v1319_v30, %v5110_v57  ;;  %v1342_v40 = vrot.slane %v1334_v32, %v5110_v57  ;;  %v1349_v41 = vrot.slane %v1335_v33, %v5110_v57 }
 0x43b   : > { %v1455_v51 = vpop.permute.xlu0 %1454  ;;  %v1457_v59 = vpop.permute.xlu1 %1456 }
 0x43c   : > { %v1350_v54 = vcombine.low %v1326_v38, %v1342_v40  ;;  %v1351_v55 = vcombine.high %v1326_v38, %v1342_v40  ;;  %v1366_v56 = vcombine.low %v1333_v39, %v1349_v41  ;;  %v1367_v58 = vcombine.high %v1333_v39, %v1349_v41 }
 0x43e   : > { %v1358_v62 = vrot.slane %v1350_v54, %v5121_v2  ;;  %v1365_v63 = vrot.slane %v1351_v55, %v5121_v2  ;;  %v1374_v0 = vrot.slane %v1366_v56, %v5121_v2  ;;  %v1381_v1 = vrot.slane %v1367_v58, %v5121_v2 }
 0x43f   : > { %v1459_v4 = vpop.permute.xlu0 %1458  ;;  %v1461_v12 = vpop.permute.xlu1 %1460  ;;  %v3753_v55 = vcombine.high %v5150_v49, %v5153_v50 }
 0x440   : > { %v1386_v8 = vcombine.low %v1358_v62, %v1365_v63  ;;  %v3755_v9 = vcombine.high %v1358_v62, %v1365_v63  ;;  %v1402_v10 = vcombine.low %v1374_v0, %v1381_v1  ;;  %v3756_v11 = vcombine.high %v1374_v0, %v1381_v1 }
 0x441   : > { %v1466_v13 = vcombine.low %v1455_v51, %v1459_v4  ;;  %v1467_v14 = vcombine.high %v1455_v51, %v1459_v4  ;;  %v1482_v15 = vcombine.low %v1457_v59, %v1461_v12  ;;  %v1483_v16 = vcombine.high %v1457_v59, %v1461_v12 }
 0x442   : > { %v1393_v17 = vrot.slane %v1386_v8, %v5110_v57  ;;  %v1401_v18 = vrot.slane %v3755_v9, %v5110_v57  ;;  %v1409_v19 = vrot.slane %v1402_v10, %v5110_v57  ;;  %v1417_v20 = vrot.slane %v3756_v11, %v5110_v57 }
 0x443   : > { %v1474_v21 = vrot.slane %v1466_v13, %v5110_v57  ;;  %v1481_v22 = vrot.slane %v1467_v14, %v5110_v57  ;;  %v1490_v23 = vrot.slane %v1482_v15, %v5110_v57  ;;  %v1497_v24 = vrot.slane %v1483_v16, %v5110_v57 }
 0x444   : > { %v1418_v25 = vcombine.low %v1393_v17, %v1401_v18  ;;  %v1434_v26 = vcombine.low %v1409_v19, %v1417_v20  ;;  %v1419_v27 = vcombine.high %v1393_v17, %v1401_v18  ;;  %v1435_v28 = vcombine.high %v1409_v19, %v1417_v20 }
 0x445   : > { %v1498_v29 = vcombine.low %v1474_v21, %v1490_v23  ;;  %v1499_v30 = vcombine.high %v1474_v21, %v1490_v23  ;;  %v1514_v32 = vcombine.low %v1481_v22, %v1497_v24  ;;  %v1515_v33 = vcombine.high %v1481_v22, %v1497_v24 }
 0x446   : > { %v1426_v34 = vrot.slane %v1418_v25, %v5121_v2  ;;  %v1442_v35 = vrot.slane %v1434_v26, %v5121_v2  ;;  %v1433_v38 = vrot.slane %v1419_v27, %v5121_v2  ;;  %v1449_v39 = vrot.slane %v1435_v28, %v5121_v2 }
 0x447   : > { %v1506_v40 = vrot.slane %v1498_v29, %v5121_v2  ;;  %v1513_v41 = vrot.slane %v1499_v30, %v5121_v2  ;;  %v1522_v51 = vrot.slane %v1514_v32, %v5121_v2  ;;  %v1529_v54 = vrot.slane %v1515_v33, %v5121_v2 }
 0x448   : > { %v1450_v56 = vcombine.low %v1426_v34, %v1442_v35  ;;  %v1451_v58 = vcombine.high %v1426_v34, %v1442_v35  ;;  %v1124_v59 = vrot.slane %v1116_v5, %v5121_v2  ;;  %v1140_v9 = vrot.slane %v1132_v7, %v5121_v2 }
 0x449   : > { %v1534_v62 = vcombine.low %v1506_v40, %v1513_v41  ;;  %v3757_v63 = vcombine.high %v1506_v40, %v1513_v41  ;;  %v1550_v0 = vcombine.low %v1522_v51, %v1529_v54  ;;  %v3758_v1 = vcombine.high %v1522_v51, %v1529_v54 }
 0x44a   : > { %v1602_v4 = vpack.c.bf16 %v1450_v56, %v1450_v56  ;;  %v1603_v8 = vpack.c.bf16 %v1451_v58, %v1451_v58  ;;  %v1452_v10 = vcombine.low %v1433_v38, %v1449_v39  ;;  %v1246_v5 = vcombine.low %v5162_v60, %v5165_v61 }
 0x44b   : > { %v1541_v11 = vrot.slane %v1534_v62, %v5110_v57  ;;  %v1549_v12 = vrot.slane %v3757_v63, %v5110_v57  ;;  %v1557_v13 = vrot.slane %v1550_v0, %v5110_v57  ;;  %v1565_v14 = vrot.slane %v3758_v1, %v5110_v57 }
 0x44c   : > { %v1919_v15 = vsel %vm1914_vm3, %v1602_v4, 0  ;;  %v1965_v16 = vsel %vm1914_vm3, %v1603_v8, 0  ;;  %v1453_v17 = vcombine.high %v1433_v38, %v1449_v39  ;;  %v3754_v7 = vcombine.high %v5162_v60, %v5165_v61 }
 0x44d   : > { %3874 = vmatpush3.bf16.xpose.msra.mxu1 %v1919_v15  ;;  %3880 = vmatpush3.bf16.xpose.msra.mxu0 %v1965_v16  ;;  %v1566_v18 = vcombine.low %v1541_v11, %v1549_v12  ;;  %v1582_v19 = vcombine.low %v1557_v13, %v1565_v14  ;;  %v1133_v20 = vcombine.high %v5156_v52, %v5159_v53 }
 0x44e   : > { %v1148_v21 = vcombine.low %v1124_v59, %v1140_v9  ;;  %v1149_v22 = vcombine.high %v1124_v59, %v1140_v9  ;;  %3885 = vmatprep.subr.bf16.mxu1 %v4586_v31  ;;  %3891 = vmatprep.subr.bf16.mxu0 %v4586_v31  ;;  %v1604_v23 = vpack.c.bf16 %v1452_v10, %v1452_v10 }
 0x44f   : > { %v1605_v24 = vpack.c.bf16 %v1453_v17, %v1453_v17  ;;  %v1574_v25 = vrot.slane %v1566_v18, %v5121_v2  ;;  %v1590_v26 = vrot.slane %v1582_v19, %v5121_v2  ;;  %v1237_v60 = vrot.slane %v1230_v3, %v5110_v57 }
 0x450   : > { %v1245_v61 = vrot.slane %v3753_v55, %v5110_v57  ;;  %v1253_v52 = vrot.slane %v1246_v5, %v5110_v57  ;;  %v1131_v53 = vrot.slane %v1117_v6, %v5121_v2  ;;  %v1261_v27 = vrot.slane %v3754_v7, %v5110_v57 }
 0x451   : > { %v1298_v28 = vpack.c.bf16 %v1148_v21, %v1148_v21  ;;  %v1299_v29 = vpack.c.bf16 %v1149_v22, %v1149_v22  ;;  %v1147_v30 = vrot.slane %v1133_v20, %v5121_v2  ;;  %v2011_v32 = vsel %vm1914_vm3, %v1604_v23, 0 }
 0x452   : > { %v1567_v33 = vcombine.high %v1541_v11, %v1549_v12  ;;  %v2057_v49 = vsel %vm1914_vm3, %v1605_v24, 0  ;;  %v1598_v50 = vcombine.low %v1574_v25, %v1590_v26  ;;  %v1599_v3 = vcombine.high %v1574_v25, %v1590_v26 }
 0x453   : > { %v1583_v34 = vcombine.high %v1557_v13, %v1565_v14  ;;  %v1262_v36 = vcombine.low %v1237_v60, %v1245_v61  ;;  %v1150_v37 = vcombine.low %v1131_v53, %v1147_v30  ;;  %v1151_v6 = vcombine.high %v1131_v53, %v1147_v30 }
 0x454   : > { %3876 = vmatmul.mubr.msk.bf16.vlgmr.msra.gmra.mrb[0].mxu1 %vm1914_vm3, %v1298_v28  ;;  %3882 = vmatmul.mubr.msk.bf16.vlgmr.msra.gmra.mrb[4].mxu0 %vm1914_vm3, %v1299_v29  ;;  %v1278_v35 = vcombine.low %v1253_v52, %v1261_v27  ;;  %v1606_v38 = vpack.c.bf16 %v1598_v50, %v1598_v50  ;;  %v1607_v39 = vpack.c.bf16 %v1599_v3, %v1599_v3 }
 0x455   : > { %3886 = vmatpush3.bf16.xpose.msra.mxu1 %v2011_v32  ;;  %3892 = vmatpush3.bf16.xpose.msra.mxu0 %v2057_v49  ;;  %v1581_v40 = vrot.slane %v1567_v33, %v5121_v2  ;;  %v1597_v41 = vrot.slane %v1583_v34, %v5121_v2  ;;  %v1300_v51 = vpack.c.bf16 %v1150_v37, %v1150_v37 }
 0x456   : > { %3887 = vmatprep.mubr.msk.bf16.mxu1 %vm4587_vm1, %v4586_v31  ;;  %3893 = vmatprep.mubr.msk.bf16.mxu0 %vm4587_vm1, %v4586_v31  ;;  %v1301_v54 = vpack.c.bf16 %v1151_v6, %v1151_v6  ;;  %v1270_v55 = vrot.slane %v1262_v36, %v5121_v2  ;;  %v1286_v56 = vrot.slane %v1278_v35, %v5121_v2  ;;  %v2103_v58 = vsel %vm1914_vm3, %v1606_v38, 0 }
 0x457   : > { %3897 = vmatprep.subr.bf16.mxu1 %v4586_v31  ;;  %3903 = vmatprep.subr.bf16.mxu0 %v4586_v31  ;;  %v2149_v59 = vsel %vm1914_vm3, %v1607_v39, 0  ;;  %v1600_v62 = vcombine.low %v1581_v40, %v1597_v41  ;;  %v1601_v63 = vcombine.high %v1581_v40, %v1597_v41  ;;  %v1263_v0 = vcombine.high %v1237_v60, %v1245_v61 }
 0x458   : > { %v1294_v1 = vcombine.low %v1270_v55, %v1286_v56  ;;  %v1295_v4 = vcombine.high %v1270_v55, %v1286_v56  ;;  %v1279_v8 = vcombine.high %v1253_v52, %v1261_v27 }
 0x459   : > { %v1608_v9 = vpack.c.bf16 %v1600_v62, %v1600_v62  ;;  %v1609_v10 = vpack.c.bf16 %v1601_v63, %v1601_v63  ;;  %v1277_v13 = vrot.slane %v1263_v0, %v5121_v2 }
 0x45a   : > { %v1302_v11 = vpack.c.bf16 %v1294_v1, %v1294_v1  ;;  %v1303_v12 = vpack.c.bf16 %v1295_v4, %v1295_v4  ;;  %v1293_v14 = vrot.slane %v1279_v8, %v5121_v2  ;;  %v1611_v4 = vpop.permute.xlu1 %1610 }
 0x45b   : > { %v2195_v5 = vsel %vm1914_vm3, %v1608_v9, 0  ;;  %v2241_v15 = vsel %vm1914_vm3, %v1609_v10, 0 }
 0x45c   : > { %3888 = vmatmul.mubr.msk.bf16.vlgmr.msra.gmra.mrb[4].mxu1 %vm1914_vm3, %v1300_v51  ;;  %3894 = vmatmul.mubr.msk.bf16.vlgmr.msra.gmra.mrb[8].mxu0 %vm1914_vm3, %v1301_v54  ;;  %v1296_v16 = vcombine.low %v1277_v13, %v1293_v14  ;;  %v1297_v17 = vcombine.high %v1277_v13, %v1293_v14 }
 0x45d   : > { %3898 = vmatpush3.bf16.xpose.msra.mxu1 %v2103_v58  ;;  %3904 = vmatpush3.bf16.xpose.msra.mxu0 %v2149_v59 }
 0x45e   : > { %3899 = vmatprep.mubr.msk.bf16.mxu1 %vm4587_vm1, %v4586_v31  ;;  %3905 = vmatprep.mubr.msk.bf16.mxu0 %vm4587_vm1, %v4586_v31  ;;  %v1304_v7 = vpack.c.bf16 %v1296_v16, %v1296_v16  ;;  %v1305_v18 = vpack.c.bf16 %v1297_v17, %v1297_v17 }
 0x45f   : > { %3909 = vmatprep.subr.bf16.mxu1 %v4586_v31  ;;  %3915 = vmatprep.subr.bf16.mxu0 %v4586_v31 }
 0x464   : > { %3900 = vmatmul.mubr.msk.bf16.vlgmr.msra.gmra.mrb[8].mxu1 %vm1914_vm3, %v1302_v11  ;;  %3906 = vmatmul.mubr.msk.bf16.vlgmr.msra.gmra.mrb[12].mxu0 %vm1914_vm3, %v1303_v12 }
 0x465   : > { %3910 = vmatpush3.bf16.xpose.msra.mxu1 %v2195_v5  ;;  %3916 = vmatpush3.bf16.xpose.msra.mxu0 %v2241_v15 }
 0x466   : > { %3911 = vmatprep.mubr.msk.bf16.mxu1 %vm4587_vm1, %v4586_v31  ;;  %3917 = vmatprep.mubr.msk.bf16.mxu0 %vm4587_vm1, %v4586_v31 }
 0x467   : > { %3921 = vmatprep.subr.bf16.mxu1 %v4586_v31  ;;  %3927 = vmatprep.subr.bf16.mxu0 %v4586_v31 }
 0x46c   : > { %3912 = vmatmul.mubr.msk.bf16.vlgmr.msra.gmra.mrb[12].mxu1 %vm1914_vm3, %v1304_v7  ;;  %3918 = vmatmul.mubr.msk.bf16.vlgmr.msra.gmra.mrb[16].mxu0 %vm1914_vm3, %v1305_v18 }
 0x46d   : > { %3923 = vmatprep.mubr.msk.bf16.mxu1 %vm4587_vm1, %v4586_v31  ;;  %3929 = vmatprep.mubr.msk.bf16.mxu0 %vm4587_vm1, %v4586_v31 }
 0x527   : > { %v1955_v19 = vpop.f32.mrb[0].mxu1  ;;  %v2001_v20 = vpop.f32.mrb[4].mxu0 }
 0x528   : > { %v3877_v21 = vpop.f32.mrb[1].mxu1  ;;  %v3883_v22 = vpop.f32.mrb[5].mxu0  ;;  %v2283_v23 = vsel %vm1914_vm3, %v1955_v19, -inf  ;;  %v2286_v24 = vsel %vm1914_vm3, %v2001_v20, -inf }
 0x529   : > { %2284 = vmax.xlane.f32.xlu0 %v2283_v23  ;;  %v1958_v25 = vpop.f32.mrb[2].mxu1  ;;  %2287 = vmax.xlane.f32.xlu1 %v2286_v24  ;;  %v2004_v26 = vpop.f32.mrb[6].mxu0 }
 0x52a   : > { %v3878_v60 = vpop.f32.mrb[3].mxu1  ;;  %v3884_v61 = vpop.f32.mrb[7].mxu0 }
 0x52f   : > { %v2047_v52 = vpop.f32.mrb[4].mxu1  ;;  %v2093_v53 = vpop.f32.mrb[8].mxu0 }
 0x530   : > { %v3889_v27 = vpop.f32.mrb[5].mxu1  ;;  %v3895_v28 = vpop.f32.mrb[9].mxu0  ;;  %v2289_v29 = vsel %vm1914_vm3, %v2047_v52, -inf  ;;  %v2292_v50 = vsel %vm1914_vm3, %v2093_v53, -inf }
 0x531   : > { %2290 = vmax.xlane.f32.xlu0 %v2289_v29  ;;  %v2050_v30 = vpop.f32.mrb[6].mxu1  ;;  %v2096_v32 = vpop.f32.mrb[10].mxu0 }
 0x532   : > { %v3890_v33 = vpop.f32.mrb[7].mxu1  ;;  %v3896_v49 = vpop.f32.mrb[11].mxu0 }
 0x535   : > { %2293 = vmax.xlane.f32.xlu0 %v2292_v50 }
 0x537   : > { %v2139_v3 = vpop.f32.mrb[8].mxu1  ;;  %v2185_v34 = vpop.f32.mrb[12].mxu0 }
 0x538   : > { %v3901_v36 = vpop.f32.mrb[9].mxu1  ;;  %v3907_v37 = vpop.f32.mrb[13].mxu0  ;;  %v2295_v6 = vsel %vm1914_vm3, %v2139_v3, -inf  ;;  %v2298_v35 = vsel %vm1914_vm3, %v2185_v34, -inf }
 0x539   : > { %v2142_v38 = vpop.f32.mrb[10].mxu1  ;;  %2296 = vmax.xlane.f32.xlu1 %v2295_v6  ;;  %2299 = vmax.xlane.f32.xlu0 %v2298_v35  ;;  %v2188_v39 = vpop.f32.mrb[14].mxu0 }
 0x53a   : > { %v3902_v40 = vpop.f32.mrb[11].mxu1  ;;  %v3908_v41 = vpop.f32.mrb[15].mxu0 }
 0x53f   : > { %v5275_v51 = vpop.f32.mrb[12].mxu1  ;;  %v5277_v54 = vpop.f32.mrb[16].mxu0 }
 0x540   : > { %v3913_v55 = vpop.f32.mrb[13].mxu1  ;;  %v3919_v56 = vpop.f32.mrb[17].mxu0  ;;  %v2301_v58 = vsel %vm1914_vm3, %v5275_v51, -inf  ;;  %v2304_v59 = vsel %vm1914_vm3, %v5277_v54, -inf }
 0x541   : > { %v2234_v62 = vpop.f32.mrb[14].mxu1  ;;  %2302 = vmax.xlane.f32.xlu1 %v2301_v58  ;;  %2305 = vmax.xlane.f32.xlu0 %v2304_v59  ;;  %v2280_v63 = vpop.f32.mrb[18].mxu0 }
 0x542   : > { %v3914_v0 = vpop.f32.mrb[15].mxu1  ;;  %v3920_v1 = vpop.f32.mrb[19].mxu0 }
 0x552   : > { %1614 = vrot.lane.b32.xlu1 %v5094_v45, %s4592_s21 }
 0x556   : > { %1616 = vrot.lane.b32.xlu1 %v5091_v44, %s4592_s21 }
 0x557   : > { %1612 = vrot.lane.b32.xlu0 %v5089_v43, %s4592_s21 }
 0x55a   : > { %1758 = vrot.lane.b32.xlu1 %v5084_v42, %s4592_s21 }
 0x5b6   : > { %v2285_v8 = vpop.xlane.xlu0 %2284  ;;  %v2288_v9 = vpop.xlane.xlu1 %2287 }
 0x5b7   : > { %v2307_v10 = vsub.f32 %v1955_v19, %v2285_v8  ;;  %v2308_v11 = vsub.f32 %v2001_v20, %v2288_v9 }
 0x5b9   : > { %v2315_v12 = vmul.f32 1.442695, %v2307_v10  ;;  %v2317_v13 = vmul.f32 1.442695, %v2308_v11 }
 0x5bb   : > { %4155 = vpow2.f32 %v2315_v12 }
 0x5bc   : > { %4157 = vpow2.f32 %v2317_v13 }
 0x5be   : > { %v2291_v14 = vpop.xlane.xlu0 %2290 }
 0x5bf   : > { %v2309_v45 = vsub.f32 %v2047_v52, %v2291_v14 }
 0x5c1   : > { %v2319_v5 = vmul.f32 1.442695, %v2309_v45 }
 0x5c2   : > { %v2294_v15 = vpop.xlane.xlu0 %2293 }
 0x5c3   : > { %4159 = vpow2.f32 %v2319_v5  ;;  %v2310_v44 = vsub.f32 %v2093_v53, %v2294_v15 }
 0x5c5   : > { %v5291_v16 = vpop.eup %4155  ;;  %v2321_v43 = vmul.f32 1.442695, %v2310_v44 }
 0x5c6   : > { %v5293_v17 = vpop.eup %4157  ;;  %v2297_v42 = vpop.xlane.xlu1 %2296  ;;  %v2331_v18 = vsel %vm1914_vm3, %v5291_v16, 0.0 }
 0x5c7   : > { %v2300_v7 = vpop.xlane.xlu0 %2299  ;;  %4161 = vpow2.f32 %v2321_v43  ;;  %v2311_v19 = vsub.f32 %v2139_v3, %v2297_v42  ;;  %2332 = vadd.xlane.f32.xlu1 %v2331_v18  ;;  %v2334_v21 = vsel %vm1914_vm3, %v5293_v17, 0.0 }
 0x5c8   : > { %v2312_v20 = vsub.f32 %v2185_v34, %v2300_v7  ;;  %2335 = vadd.xlane.f32.xlu0 %v2334_v21 }
 0x5c9   : > { %v2323_v22 = vmul.f32 1.442695, %v2311_v19 }
 0x5ca   : > { %v2325_v23 = vmul.f32 1.442695, %v2312_v20 }
 0x5cb   : > { %4163 = vpow2.f32 %v2323_v22 }
 0x5cc   : > { %4165 = vpow2.f32 %v2325_v23 }
 0x5cd   : > { %v5299_v24 = vpop.eup %4159 }
 0x5ce   : > { %v5301_v25 = vpop.xlane.xlu1 %2302  ;;  %v2337_v26 = vsel %vm1914_vm3, %v5299_v24, 0.0  ;;  %v5305_v60 = vpop.xlane.xlu0 %2305 }
 0x5cf   : > { %2338 = vadd.xlane.f32.xlu0 %v2337_v26  ;;  %v2314_v22 = vsub.f32 %v5277_v54, %v5305_v60 }
 0x5d1   : > { %v5307_v61 = vpop.eup %4161  ;;  %v2329_v23 = vmul.f32 1.442695, %v2314_v22 }
 0x5d2   : > { %v1615_v52 = vpop.permute.xlu1 %1614  ;;  %v2340_v53 = vsel %vm1914_vm3, %v5307_v61, 0.0  ;;  %v1613_v30 = vpop.permute.xlu0 %1612 }
 0x5d3   : > { %2341 = vadd.xlane.f32.xlu1 %v2340_v53  ;;  %v1622_v28 = vcombine.low %v1611_v4, %v1615_v52  ;;  %v1623_v29 = vcombine.high %v1611_v4, %v1615_v52  ;;  %4167 = vpow2.f32 %v2329_v23 }
 0x5d5   : > { %v5311_v27 = vpop.eup %4163  ;;  %v1630_v34 = vrot.slane %v1622_v28, %v5110_v57  ;;  %v1637_v36 = vrot.slane %v1623_v29, %v5110_v57 }
 0x5d6   : > { %v1617_v32 = vpop.permute.xlu1 %1616  ;;  %v2343_v33 = vsel %vm1914_vm3, %v5311_v27, 0.0  ;;  %v5315_v49 = vpop.eup %4165 }
 0x5d7   : > { %v1638_v50 = vcombine.low %v1613_v30, %v1617_v32  ;;  %v1639_v3 = vcombine.high %v1613_v30, %v1617_v32  ;;  %2344 = vadd.xlane.f32.xlu0 %v2343_v33  ;;  %v2346_v35 = vsel %vm1914_vm3, %v5315_v49, 0.0 }
 0x5d9   : > { %v1646_v37 = vrot.slane %v1638_v50, %v5110_v57  ;;  %v1653_v6 = vrot.slane %v1639_v3, %v5110_v57 }
 0x5da   : > { %v1759_v54 = vpop.permute.xlu1 %1758 }
 0x5db   : > { %v1654_v38 = vcombine.low %v1630_v34, %v1646_v37  ;;  %v1655_v39 = vcombine.high %v1630_v34, %v1646_v37  ;;  %v1670_v40 = vcombine.low %v1637_v36, %v1653_v6  ;;  %v1671_v41 = vcombine.high %v1637_v36, %v1653_v6  ;;  %2347 = vadd.xlane.f32.xlu0 %v2346_v35 }
 0x5dd   : > { %v1662_v55 = vrot.slane %v1654_v38, %v5121_v2  ;;  %v1669_v56 = vrot.slane %v1655_v39, %v5121_v2  ;;  %v1678_v58 = vrot.slane %v1670_v40, %v5121_v2  ;;  %v1685_v59 = vrot.slane %v1671_v41, %v5121_v2  ;;  %v5349_v52 = vpop.eup %4167 }
 0x5de   : > { %v2352_v53 = vsel %vm1914_vm3, %v5349_v52, 0.0 }
 0x5df   : > { %v1690_v62 = vcombine.low %v1662_v55, %v1669_v56  ;;  %v3759_v63 = vcombine.high %v1662_v55, %v1669_v56  ;;  %v1706_v0 = vcombine.low %v1678_v58, %v1685_v59  ;;  %v3760_v1 = vcombine.high %v1678_v58, %v1685_v59 }
 0x5e1   : > { %v1697_v4 = vrot.slane %v1690_v62, %v5110_v57  ;;  %v1705_v8 = vrot.slane %v3759_v63, %v5110_v57  ;;  %v1713_v9 = vrot.slane %v1706_v0, %v5110_v57  ;;  %v1721_v10 = vrot.slane %v3760_v1, %v5110_v57 }
 0x5e3   : > { %v1722_v11 = vcombine.low %v1697_v4, %v1705_v8  ;;  %v1738_v12 = vcombine.low %v1713_v9, %v1721_v10  ;;  %v1723_v13 = vcombine.high %v1697_v4, %v1705_v8  ;;  %v1739_v14 = vcombine.high %v1713_v9, %v1721_v10 }
 0x5e4   : > { %1762 = vrot.lane.b32.xlu1 %v5102_v47, %s4592_s21 }
 0x5e5   : > { %v1730_v45 = vrot.slane %v1722_v11, %v5121_v2  ;;  %v1746_v5 = vrot.slane %v1738_v12, %v5121_v2  ;;  %v1737_v15 = vrot.slane %v1723_v13, %v5121_v2  ;;  %v1753_v44 = vrot.slane %v1739_v14, %v5121_v2 }
 0x5e7   : > { %v1754_v43 = vcombine.low %v1730_v45, %v1746_v5  ;;  %v1755_v42 = vcombine.high %v1730_v45, %v1746_v5  ;;  %v1756_v7 = vcombine.low %v1737_v15, %v1753_v44  ;;  %v1757_v18 = vcombine.high %v1737_v15, %v1753_v44 }
 0x5e8   : > { %1764 = vrot.lane.b32.xlu1 %v5104_v48, %s4592_s21  ;;  %v2313_v48 = vsub.f32 %v5275_v51, %v5301_v25 }
 0x5e9   : > { %v1906_v19 = vpack.c.bf16 %v1754_v43, %v1754_v43  ;;  %v1907_v20 = vpack.c.bf16 %v1755_v42, %v1755_v42  ;;  %v1908_v50 = vpack.c.bf16 %v1756_v7, %v1756_v7  ;;  %v1909_v34 = vpack.c.bf16 %v1757_v18, %v1757_v18 }
 0x5ea   : > { %v2327_v26 = vmul.f32 1.442695, %v2313_v48 }
 0x5eb   : > { %v2384_v47 = vsel %vm2382_vm4, %v1906_v19, 0  ;;  %v2430_v21 = vsel %vm2382_vm4, %v1907_v20, 0  ;;  %v2476_v6 = vsel %vm2382_vm4, %v1908_v50, 0  ;;  %v2522_v38 = vsel %vm2382_vm4, %v1909_v34, 0 }
 0x5ec   : > { %3922 = vmatpush3.bf16.msra.mxu1 %v2384_v47  ;;  %3928 = vmatpush3.bf16.msra.mxu0 %v2430_v21  ;;  %4169 = vpow2.f32 %v2327_v26 }
 0x5ed   : > { %3933 = vmatprep.subr.bf16.mxu1 %v4586_v31  ;;  %3939 = vmatprep.subr.bf16.mxu0 %v4586_v31 }
 0x5f1   : > { %1760 = vrot.lane.b32.xlu0 %v5098_v46, %s4592_s21 }
 0x5f6   : > { %v5353_v28 = vpop.eup %4169 }
 0x5f7   : > { %v2349_v46 = vsel %vm1914_vm3, %v5353_v28, 0.0 }
 0x60c   : > { %2353 = vadd.xlane.f32.xlu1 %v2352_v53 }
 0x610   : > { %2350 = vadd.xlane.f32.xlu0 %v2349_v46 }
 0x654   : > { %v2333_v60 = vpop.xlane.xlu1 %2332 }
 0x655   : > { %4171 = vrcp.f32 %v2333_v60  ;;  %v2336_v51 = vpop.xlane.xlu0 %2335 }
 0x656   : > { %4173 = vrcp.f32 %v2336_v51 }
 0x65c   : > { %v2339_v25 = vpop.xlane.xlu0 %2338 }
 0x65d   : > { %4175 = vrcp.f32 %v2339_v25 }
 0x65f   : > { %v4172_v29 = vpop.eup %4171 }
 0x660   : > { %v4174_v30 = vpop.eup %4173  ;;  %v2363_v32 = vmul.f32 %v4172_v29, %v5291_v16  ;;  %v2342_v33 = vpop.xlane.xlu1 %2341 }
 0x661   : > { %v2364_v3 = vmul.f32 %v4174_v30, %v5293_v17  ;;  %4177 = vrcp.f32 %v2342_v33 }
 0x662   : > { %v2371_v36 = vpack.c.bf16 %v2363_v32, %v2363_v32 }
 0x663   : > { %v2372_v37 = vpack.c.bf16 %v2364_v3, %v2364_v3 }
 0x664   : > { %3924 = vmatmul.mubr.msk.bf16.vlgmr.msra.gmra.mrb[16].mxu1 %vm1914_vm3, %v2371_v36  ;;  %v2345_v35 = vpop.xlane.xlu0 %2344  ;;  %v1763_v39 = vpop.permute.xlu1 %1762 }
 0x665   : > { %3930 = vmatmul.mubr.msk.bf16.vlgmr.msra.gmra.mrb[20].mxu0 %vm1914_vm3, %v2372_v37  ;;  %3934 = vmatpush3.bf16.msra.mxu1 %v2476_v6  ;;  %v1770_v56 = vcombine.low %v1759_v54, %v1763_v39  ;;  %v1771_v58 = vcombine.high %v1759_v54, %v1763_v39  ;;  %4179 = vrcp.f32 %v2345_v35 }
 0x666   : > { %3940 = vmatpush3.bf16.msra.mxu0 %v2522_v38  ;;  %3935 = vmatprep.mubr.msk.bf16.mxu1 %vm4587_vm1, %v4586_v31 }
 0x667   : > { %v4176_v16 = vpop.eup %4175  ;;  %3941 = vmatprep.mubr.msk.bf16.mxu0 %vm4587_vm1, %v4586_v31  ;;  %3945 = vmatprep.subr.bf16.mxu1 %v4586_v31  ;;  %v1785_v8 = vrot.slane %v1771_v58, %v5110_v57 }
 0x668   : > { %v2365_v17 = vmul.f32 %v4176_v16, %v5299_v24  ;;  %v2348_v40 = vpop.xlane.xlu0 %2347  ;;  %3951 = vmatprep.subr.bf16.mxu0 %v4586_v31  ;;  %v1765_v62 = vpop.permute.xlu1 %1764  ;;  %v1778_v24 = vrot.slane %v1770_v56, %v5110_v57 }
 0x669   : > { %4181 = vrcp.f32 %v2348_v40 }
 0x66a   : > { %v2373_v41 = vpack.c.bf16 %v2365_v17, %v2365_v17 }
 0x66b   : > { %v4178_v55 = vpop.eup %4177 }
 0x66c   : > { %v2366_v59 = vmul.f32 %v4178_v55, %v5307_v61  ;;  %3936 = vmatmul.mubr.msk.bf16.vlgmr.msra.gmra.mrb[20].mxu1 %vm1914_vm3, %v2373_v41  ;;  %v1761_v63 = vpop.permute.xlu0 %1760 }
 0x66d   : > { %v1786_v0 = vcombine.low %v1761_v63, %v1765_v62  ;;  %v1787_v1 = vcombine.high %v1761_v63, %v1765_v62  ;;  %3947 = vmatprep.mubr.msk.bf16.mxu1 %vm4587_vm1, %v4586_v31 }
 0x66e   : > { %v2374_v4 = vpack.c.bf16 %v2366_v59, %v2366_v59 }
 0x66f   : > { %v1794_v9 = vrot.slane %v1786_v0, %v5110_v57  ;;  %v1801_v10 = vrot.slane %v1787_v1, %v5110_v57  ;;  %v4180_v26 = vpop.eup %4179 }
 0x670   : > { %3942 = vmatmul.mubr.msk.bf16.vlgmr.msra.gmra.mrb[24].mxu0 %vm1914_vm3, %v2374_v4  ;;  %v2367_v33 = vmul.f32 %v4180_v26, %v5311_v27 }
 0x671   : > { %v1802_v61 = vcombine.low %v1778_v24, %v1794_v9  ;;  %v1803_v11 = vcombine.high %v1778_v24, %v1794_v9  ;;  %v1818_v12 = vcombine.low %v1785_v8, %v1801_v10  ;;  %v1819_v13 = vcombine.high %v1785_v8, %v1801_v10  ;;  %3953 = vmatprep.mubr.msk.bf16.mxu0 %vm4587_vm1, %v4586_v31 }
 0x672   : > { %v2375_v38 = vpack.c.bf16 %v2367_v33, %v2367_v33 }
 0x673   : > { %v1810_v14 = vrot.slane %v1802_v61, %v5121_v2  ;;  %v1817_v45 = vrot.slane %v1803_v11, %v5121_v2  ;;  %v1826_v5 = vrot.slane %v1818_v12, %v5121_v2  ;;  %v1833_v15 = vrot.slane %v1819_v13, %v5121_v2  ;;  %v4182_v51 = vpop.eup %4181 }
 0x674   : > { %v2368_v50 = vmul.f32 %v4182_v51, %v5315_v49 }
 0x675   : > { %v1838_v44 = vcombine.low %v1810_v14, %v1817_v45  ;;  %v3761_v43 = vcombine.high %v1810_v14, %v1817_v45  ;;  %v1854_v42 = vcombine.low %v1826_v5, %v1833_v15  ;;  %v3762_v7 = vcombine.high %v1826_v5, %v1833_v15 }
 0x676   : > { %v2376_v39 = vpack.c.bf16 %v2368_v50, %v2368_v50 }
 0x677   : > { %v1845_v18 = vrot.slane %v1838_v44, %v5110_v57  ;;  %v1853_v19 = vrot.slane %v3761_v43, %v5110_v57  ;;  %v1861_v20 = vrot.slane %v1854_v42, %v5110_v57  ;;  %v1869_v47 = vrot.slane %v3762_v7, %v5110_v57 }
 0x679   : > { %v1870_v21 = vcombine.low %v1845_v18, %v1853_v19  ;;  %v1886_v22 = vcombine.low %v1861_v20, %v1869_v47  ;;  %v1871_v48 = vcombine.high %v1845_v18, %v1853_v19  ;;  %v1887_v23 = vcombine.high %v1861_v20, %v1869_v47 }
 0x67b   : > { %v1878_v53 = vrot.slane %v1870_v21, %v5121_v2  ;;  %v1894_v46 = vrot.slane %v1886_v22, %v5121_v2  ;;  %v1885_v54 = vrot.slane %v1871_v48, %v5121_v2  ;;  %v1901_v60 = vrot.slane %v1887_v23, %v5121_v2 }
 0x67d   : > { %v1902_v25 = vcombine.low %v1878_v53, %v1894_v46  ;;  %v1903_v29 = vcombine.high %v1878_v53, %v1894_v46  ;;  %v1904_v30 = vcombine.low %v1885_v54, %v1901_v60  ;;  %v1905_v32 = vcombine.high %v1885_v54, %v1901_v60 }
 0x67f   : > { %v1910_v3 = vpack.c.bf16 %v1902_v25, %v1902_v25  ;;  %v1911_v34 = vpack.c.bf16 %v1903_v29, %v1903_v29  ;;  %v1912_v6 = vpack.c.bf16 %v1904_v30, %v1904_v30  ;;  %v1913_v35 = vpack.c.bf16 %v1905_v32, %v1905_v32 }
 0x681   : > { %v2568_v36 = vsel %vm2382_vm4, %v1910_v3, 0  ;;  %v2614_v37 = vsel %vm2382_vm4, %v1911_v34, 0  ;;  %v2660_v27 = vsel %vm2382_vm4, %v1912_v6, 0  ;;  %v2706_v49 = vsel %vm2382_vm4, %v1913_v35, 0 }
 0x682   : > { %3946 = vmatpush3.bf16.msra.mxu1 %v2568_v36  ;;  %3952 = vmatpush3.bf16.msra.mxu0 %v2614_v37 }
 0x683   : > { %3957 = vmatprep.subr.bf16.mxu1 %v4586_v31  ;;  %3963 = vmatprep.subr.bf16.mxu0 %v4586_v31 }
 0x685   : > { %3948 = vmatmul.mubr.msk.bf16.vlgmr.msra.gmra.mrb[24].mxu1 %vm1914_vm3, %v2375_v38  ;;  %3954 = vmatmul.mubr.msk.bf16.vlgmr.msra.gmra.mrb[28].mxu0 %vm1914_vm3, %v2376_v39 }
 0x686   : > { %3958 = vmatpush3.bf16.msra.mxu1 %v2660_v27  ;;  %3964 = vmatpush3.bf16.msra.mxu0 %v2706_v49 }
 0x687   : > { %3965 = vmatprep.mubr.msk.bf16.mxu0 %vm4587_vm1, %v4586_v31  ;;  %3959 = vmatprep.mubr.msk.bf16.mxu1 %vm4587_vm1, %v4586_v31 }
 0x688   : > { %3969 = vmatprep.subr.bf16.mxu1 %v4586_v31  ;;  %3977 = vmatprep.subr.bf16.mxu0 %v4586_v31 }
 0x699   : > { %v2354_v16 = vpop.xlane.xlu1 %2353 }
 0x69a   : > { %4183 = vrcp.f32 %v2354_v16 }
 0x69d   : > { %v2351_v17 = vpop.xlane.xlu0 %2350 }
 0x69e   : > { %4185 = vrcp.f32 %v2351_v17 }
 0x6a4   : > { %v4184_v40 = vpop.eup %4183 }
 0x6a5   : > { %v2370_v41 = vmul.f32 %v4184_v40, %v5349_v52 }
 0x6a7   : > { %v2378_v55 = vpack.c.bf16 %v2370_v41, %v2370_v41 }
 0x6a8   : > { %v4186_v56 = vpop.eup %4185 }
 0x6a9   : > { %v2369_v58 = vmul.f32 %v4186_v56, %v5353_v28  ;;  %3966 = vmatmul.mubr.msk.bf16.vlgmr.msra.gmra.mrb[32].mxu0 %vm1914_vm3, %v2378_v55 }
 0x6aa   : > { %3981 = vmatprep.mubr.msk.bf16.mxu0 %vm4587_vm1, %v4586_v31 }
 0x6ab   : > { %v2377_v59 = vpack.c.bf16 %v2369_v58, %v2369_v58 }
 0x6ad   : > { %3960 = vmatmul.mubr.msk.bf16.vlgmr.msra.gmra.mrb[28].mxu1 %vm1914_vm3, %v2377_v59 }
 0x6ae   : > { %3973 = vmatprep.mubr.msk.bf16.mxu1 %vm4587_vm1, %v4586_v31 }
 0x737   : > { %v2420_v62 = vpop.f32.mrb[16].mxu1 }
 0x738   : > { %v2466_v63 = vpop.f32.mrb[20].mxu0  ;;  %v3925_v0 = vpop.f32.mrb[17].mxu1 }
 0x739   : > { %v3931_v1 = vpop.f32.mrb[21].mxu0  ;;  %v2423_v52 = vpop.f32.mrb[18].mxu1 }
 0x73a   : > { %v2469_v4 = vpop.f32.mrb[22].mxu0  ;;  %v3926_v24 = vpop.f32.mrb[19].mxu1 }
 0x73b   : > { %v3932_v8 = vpop.f32.mrb[23].mxu0 }
 0x73f   : > { %v2512_v28 = vpop.f32.mrb[20].mxu1 }
 0x740   : > { %v2748_v9 = vcombine.low %v2420_v62, %v2512_v28  ;;  %v2749_v10 = vcombine.high %v2420_v62, %v2512_v28  ;;  %v3937_v61 = vpop.f32.mrb[21].mxu1 }
 0x741   : > { %v2515_v11 = vpop.f32.mrb[22].mxu1 }
 0x742   : > { %v3938_v12 = vpop.f32.mrb[23].mxu1  ;;  %v2756_v44 = vrot.slane %v2748_v9, %v5110_v57  ;;  %v2763_v43 = vrot.slane %v2749_v10, %v5110_v57 }
 0x743   : > { %v2558_v13 = vpop.f32.mrb[24].mxu0 }
 0x744   : > { %v2764_v14 = vcombine.low %v2466_v63, %v2558_v13  ;;  %v2765_v45 = vcombine.high %v2466_v63, %v2558_v13  ;;  %v3943_v5 = vpop.f32.mrb[25].mxu0 }
 0x745   : > { %v2561_v15 = vpop.f32.mrb[26].mxu0 }
 0x746   : > { %v2772_v42 = vrot.slane %v2764_v14, %v5110_v57  ;;  %v2779_v7 = vrot.slane %v2765_v45, %v5110_v57  ;;  %v3944_v18 = vpop.f32.mrb[27].mxu0 }
 0x748   : > { %v2780_v19 = vcombine.low %v2756_v44, %v2772_v42  ;;  %v2781_v20 = vcombine.high %v2756_v44, %v2772_v42  ;;  %v2796_v47 = vcombine.low %v2763_v43, %v2779_v7  ;;  %v2797_v21 = vcombine.high %v2763_v43, %v2779_v7 }
 0x74a   : > { %v2788_v22 = vrot.slane %v2780_v19, %v5121_v2  ;;  %v2795_v48 = vrot.slane %v2781_v20, %v5121_v2  ;;  %v2804_v23 = vrot.slane %v2796_v47, %v5121_v2  ;;  %v2811_v26 = vrot.slane %v2797_v21, %v5121_v2  ;;  %v4147_v21 = vld [vmem:[%s5036_s26] sm:$0xff]  }
 0x74b   : > { %3970 = vmatpush3.bf16.msra.mxu1 %v4147_v21 }
 0x74c   : > { %v2816_v53 = vcombine.low %v2788_v22, %v2795_v48  ;;  %v3779_v46 = vcombine.high %v2788_v22, %v2795_v48  ;;  %v2832_v54 = vcombine.low %v2804_v23, %v2811_v26  ;;  %v3780_v60 = vcombine.high %v2804_v23, %v2811_v26  ;;  %3971 = vmatprep.subr.bf16.mxu1 %v4586_v31 }
 0x74e   : > { %v2823_v51 = vrot.slane %v2816_v53, %v5110_v57  ;;  %v2831_v25 = vrot.slane %v3779_v46, %v5110_v57  ;;  %v2839_v29 = vrot.slane %v2832_v54, %v5110_v57  ;;  %v2847_v30 = vrot.slane %v3780_v60, %v5110_v57 }
 0x750   : > { %v2849_v32 = vcombine.high %v2823_v51, %v2831_v25  ;;  %v2865_v33 = vcombine.high %v2839_v29, %v2847_v30  ;;  %v2848_v50 = vcombine.low %v2823_v51, %v2831_v25  ;;  %v2864_v3 = vcombine.low %v2839_v29, %v2847_v30  ;;  %v4148_v51 = vld [vmem:[%s5036_s26 + $0x8] sm:$0xff]   ;;  %s4596_s26 = smov 8  }
 0x751   : > { %3972 = vmatpush3.bf16.msra.mxu1 %v4148_v51 }
 0x752   : > { %v5430_v34 = vrot.slane %v2849_v32, %v5121_v2  ;;  %v5433_v36 = vrot.slane %v2865_v33, %v5121_v2  ;;  %v5436_v37 = vrot.slane %v2848_v50, %v5121_v2  ;;  %v5439_v6 = vrot.slane %v2864_v3, %v5121_v2  ;;  %3985 = vmatprep.subr.bf16.mxu1 %v4586_v31 }
 0x754   : > { %v2882_v35 = vcombine.low %v5430_v34, %v5433_v36  ;;  %v2880_v38 = vcombine.low %v5436_v37, %v5439_v6  ;;  %v2881_v39 = vcombine.high %v5436_v37, %v5439_v6  ;;  %v2883_v27 = vcombine.high %v5430_v34, %v5433_v36  ;;  %v3783_v37 = vld [vmem:[%s723_s3] ss:$0 sm:$0xff] }
 0x758   : > { %v2604_v49 = vpop.f32.mrb[24].mxu1  ;;  %v2650_v16 = vpop.f32.mrb[28].mxu0 }
 0x759   : > { %v3949_v17 = vpop.f32.mrb[25].mxu1  ;;  %v3955_v40 = vpop.f32.mrb[29].mxu0 }
 0x75a   : > { %v2607_v41 = vpop.f32.mrb[26].mxu1  ;;  %v2653_v55 = vpop.f32.mrb[30].mxu0 }
 0x75b   : > { %v3950_v56 = vpop.f32.mrb[27].mxu1  ;;  %v3956_v58 = vpop.f32.mrb[31].mxu0 }
 0x77c   : > { %v2742_v59 = vpop.f32.mrb[32].mxu0 }
 0x77d   : > { %v2917_v62 = vcombine.low %v2650_v16, %v2742_v59  ;;  %v2918_v63 = vcombine.high %v2650_v16, %v2742_v59  ;;  %v3967_v0 = vpop.f32.mrb[33].mxu0 }
 0x77e   : > { %v2745_v1 = vpop.f32.mrb[34].mxu0 }
 0x77f   : > { %v3968_v52 = vpop.f32.mrb[35].mxu0  ;;  %v2925_v10 = vrot.slane %v2917_v62, %v5110_v57  ;;  %v2932_v61 = vrot.slane %v2918_v63, %v5110_v57 }
 0x780   : > { %v2696_v4 = vpop.f32.mrb[28].mxu1 }
 0x781   : > { %v2901_v24 = vcombine.low %v2604_v49, %v2696_v4  ;;  %v2902_v8 = vcombine.high %v2604_v49, %v2696_v4  ;;  %v3961_v28 = vpop.f32.mrb[29].mxu1 }
 0x782   : > { %v2699_v9 = vpop.f32.mrb[30].mxu1  ;;  %v4199_v28 = vld [vmem:[#allocation14] sm:$0xff] }
 0x783   : > { %v2909_v11 = vrot.slane %v2901_v24, %v5110_v57  ;;  %v2916_v12 = vrot.slane %v2902_v8, %v5110_v57  ;;  %v3962_v13 = vpop.f32.mrb[31].mxu1 }
 0x785   : > { %v2933_v14 = vcombine.low %v2909_v11, %v2925_v10  ;;  %v2934_v45 = vcombine.high %v2909_v11, %v2925_v10  ;;  %v2949_v5 = vcombine.low %v2916_v12, %v2932_v61  ;;  %v2950_v15 = vcombine.high %v2916_v12, %v2932_v61  ;;  %v4200_v61 = vld [vmem:[#allocation14 + $0x8] sm:$0xff] }
 0x787   : > { %v2941_v44 = vrot.slane %v2933_v14, %v5121_v2  ;;  %v2948_v43 = vrot.slane %v2934_v45, %v5121_v2  ;;  %v2957_v42 = vrot.slane %v2949_v5, %v5121_v2  ;;  %v2964_v7 = vrot.slane %v2950_v15, %v5121_v2 }
 0x789   : > { %v2969_v18 = vcombine.low %v2941_v44, %v2948_v43  ;;  %v3781_v19 = vcombine.high %v2941_v44, %v2948_v43  ;;  %v2985_v20 = vcombine.low %v2957_v42, %v2964_v7  ;;  %v3782_v47 = vcombine.high %v2957_v42, %v2964_v7 }
 0x78b   : > { %v2976_v22 = vrot.slane %v2969_v18, %v5110_v57  ;;  %v2984_v48 = vrot.slane %v3781_v19, %v5110_v57  ;;  %v2992_v23 = vrot.slane %v2985_v20, %v5110_v57  ;;  %v3000_v26 = vrot.slane %v3782_v47, %v5110_v57  ;;  %v4149_v19 = vld [vmem:[%s5041_s1] sm:$0xff]   ;;  %v4150_v20 = vld [vmem:[%s5041_s1 + $0x8] sm:$0xff]   ;;  %s5680_s1 = sld [smem:[#allocation37_spill]] (!%p3801_p0) }
 0x78c   : > { %3978 = vmatpush3.bf16.msra.mxu0 %v4149_v19 }
 0x78d   : > { %v3002_v53 = vcombine.high %v2976_v22, %v2984_v48  ;;  %v3018_v46 = vcombine.high %v2992_v23, %v3000_v26  ;;  %v3001_v54 = vcombine.low %v2976_v22, %v2984_v48  ;;  %v3017_v60 = vcombine.low %v2992_v23, %v3000_v26  ;;  %3979 = vmatprep.subr.bf16.mxu0 %v4586_v31 }
 0x78f   : > { %v3016_v25 = vrot.slane %v3002_v53, %v5121_v2  ;;  %v3032_v29 = vrot.slane %v3018_v46, %v5121_v2  ;;  %v3009_v30 = vrot.slane %v3001_v54, %v5121_v2  ;;  %v3025_v32 = vrot.slane %v3017_v60, %v5121_v2  ;;  %v3787_v46 = vld [vmem:[%s731_s7] ss:$0 sm:$0xff] }
 0x790   : > { %3980 = vmatpush3.bf16.msra.mxu0 %v4150_v20 }
 0x791   : > { %v3035_v33 = vcombine.low %v3016_v25, %v3032_v29  ;;  %v3034_v50 = vcombine.high %v3009_v30, %v3025_v32  ;;  %v3033_v57 = vcombine.low %v3009_v30, %v3025_v32  ;;  %v3036_v3 = vcombine.high %v3016_v25, %v3032_v29  ;;  %v3788_v29 = vld [vmem:[%s739_s8] ss:$0 sm:$0xff] }
 0x793   : > { %v4135_v34 = vpack.i.bf16 %v3035_v33, %v2882_v35  ;;  %v4130_v36 = vpack.i.bf16 %v3034_v50, %v2881_v39  ;;  %v4140_v49 = vpack.i.bf16 %v3036_v3, %v2883_v27  ;;  %v4152_v3 = vld [vmem:[%s5046_s20 + $0x8] sm:$0xff]  }
 0x795   : > { %4136 = vrot.lane.b32.xlu1 %v4135_v34, %s4595_s27  ;;  %4131 = vrot.lane.b32.xlu0 %v4130_v36, %s4596_s26  ;;  %v4153_v34 = vld [vmem:[%s5046_s20 + $0x10] sm:$0xff]   ;;  %v4154_v36 = vld [vmem:[%s5046_s20 + $0x18] sm:$0xff]  }
 0x799   : > { %4141 = vrot.lane.b32.xlu0 %v4140_v49, %s4597_s23  ;;  %v3789_v49 = vld [vmem:[%s747_s29] ss:$0 sm:$0xff]  ;;  %s5681_s29 = sld [smem:[#allocation38_spill]] (!%p3801_p0) }
 0x807   : > { %v4137_v16 = vpop.permute.xlu1 %4136  ;;  %v4132_v17 = vpop.permute.xlu0 %4131 }
 0x808   : > { %v4134_v2 = vunpack.i.h.bf16 %v4132_v17  ;;  %v4133_v40 = vunpack.i.l.bf16 %v4132_v17  ;;  %v4139_v41 = vunpack.i.h.bf16 %v4137_v16  ;;  %v4138_v55 = vunpack.i.l.bf16 %v4137_v16 }
 0x80a   : > { %v2896_v35 = vsel %vm1914_vm3, %v2880_v38, %v4133_v40  ;;  %v3049_v39 = vsel %vm1914_vm3, %v3033_v57, %v4134_v2  ;;  %v4151_v57 = vld [vmem:[%s5046_s20] sm:$0xff]  }
 0x80b   : > { %v4142_v27 = vpop.permute.xlu0 %4141  ;;  %v2898_v59 = vsel %vm2897_vm5, %v2896_v35, %v4138_v55  ;;  %v3050_v62 = vsel %vm2897_vm5, %v3049_v39, %v4139_v41 }
 0x80c   : > { %v4144_v56 = vunpack.i.h.bf16 %v4142_v27  ;;  %v4143_v58 = vunpack.i.l.bf16 %v4142_v27 }
 0x80e   : > { %v2900_v63 = vsel %vm2899_vm6, %v2898_v59, %v4143_v58  ;;  %v3051_v0 = vsel %vm2899_vm6, %v3050_v62, %v4144_v56 }
 0x80f   : > { %v3052_v1 = vpack.c.bf16 %v3051_v0, %v2900_v63 }
 0x811   : > { %3974 = vmatmul.mubr.msk.bf16.vlgmr.msra.gmra.mrb[32].mxu1 %vm961_vm2, %v3052_v1 }
 0x812   : > { %3993 = vmatprep.mubr.msk.bf16.mxu1 %vm4587_vm1, %v4586_v31  ;;  %3986 = vmatpush3.bf16.msra.mxu1 %v4151_v57 }
 0x813   : > { %3987 = vmatprep.subr.bf16.mxu1 %v4586_v31 }
 0x816   : > { %3988 = vmatpush3.bf16.msra.mxu1 %v4152_v3 }
 0x817   : > { %3989 = vmatprep.subr.bf16.mxu1 %v4586_v31 }
 0x81a   : > { %3990 = vmatpush3.bf16.msra.mxu1 %v4153_v34 }
 0x81b   : > { %3991 = vmatprep.subr.bf16.mxu1 %v4586_v31 }
 0x81e   : > { %3992 = vmatpush3.bf16.msra.mxu1 %v4154_v36  ;;  %v4201_v36 = vld [vmem:[%s5680_s1] sm:$0xff] (!%p3801_p0)  }
 0x8e4   : > { %v3113_v6 = vpop.f32.mrb[32].mxu1 }
 0x8e5   : > { %v3114_v38 = vadd.f32 %v3783_v37, %v3113_v6  ;;  %v3975_v52 = vpop.f32.mrb[33].mxu1 }
 0x8e6   : > { %v3116_v4 = vpop.f32.mrb[34].mxu1 }
 0x8e7   : > { %v3117_v24 = vadd.f32 %v3783_v37, %v3116_v4  ;;  %v3976_v8 = vpop.f32.mrb[35].mxu1  ;;  %v3120_v9 = vadd.f32 %v4199_v28, %v3114_v38 }
 0x8e9   : > { %v3124_v10 = vsel %vm961_vm2, %v3120_v9, 0.0  ;;  %v3121_v11 = vadd.f32 %v4200_v61, %v3117_v24 }
 0x8ea   : > { %3125 = vadd.xlane.f32.xlu1 %v3124_v10 }
 0x8eb   : > { %v3127_v12 = vsel %vm961_vm2, %v3121_v11, 0.0 }
 0x8ec   : > { %3128 = vadd.xlane.f32.xlu0 %v3127_v12 }
 0x977   : > { %v3126_v13 = vpop.xlane.xlu1 %3125 }
 0x978   : > { %v3131_v14 = vmul.f32 0.03125, %v3126_v13 }
 0x979   : > { %v3129_v45 = vpop.xlane.xlu0 %3128 }
 0x97a   : > { %v3133_v5 = vsub.f32 %v3120_v9, %v3131_v14  ;;  %v3132_v15 = vmul.f32 0.03125, %v3129_v45  ;;  %v3793_v9 = vld [vmem:[%s755_s18] ss:$0 sm:$0xff] }
 0x97c   : > { %v3134_v44 = vsub.f32 %v3121_v11, %v3132_v15  ;;  %v3135_v43 = vmul.f32 %v3133_v5, %v3133_v5 }
 0x97e   : > { %v3137_v42 = vsel %vm961_vm2, %v3135_v43, 0.0  ;;  %v3136_v7 = vmul.f32 %v3134_v44, %v3134_v44 }
 0x97f   : > { %3138 = vadd.xlane.f32.xlu0 %v3137_v42 }
 0x980   : > { %v3140_v18 = vsel %vm961_vm2, %v3136_v7, 0.0 }
 0x981   : > { %3141 = vadd.xlane.f32.xlu1 %v3140_v18 }
 0xa0c   : > { %v3139_v47 = vpop.xlane.xlu0 %3138 }
 0xa0d   : > { %v3143_v21 = vmul.f32 0.03125, %v3139_v47 }
 0xa0e   : > { %v3142_v22 = vpop.xlane.xlu1 %3141 }
 0xa0f   : > { %v3145_v48 = vadd.f32 1e-12, %v3143_v21  ;;  %v3144_v23 = vmul.f32 0.03125, %v3142_v22 }
 0xa11   : > { %4187 = vrsqrt.f32 %v3145_v48  ;;  %v3146_v26 = vadd.f32 1e-12, %v3144_v23 }
 0xa13   : > { %4189 = vrsqrt.f32 %v3146_v26 }
 0xa1b   : > { %v4188_v53 = vpop.eup %4187 }
 0xa1c   : > { %v3149_v54 = vmul.f32 %v4188_v53, %v3133_v5 }
 0xa1d   : > { %v4190_v60 = vpop.eup %4189 }
 0xa1e   : > { %v3157_v51 = vmul.f32 %v3787_v46, %v3149_v54  ;;  %v3150_v25 = vmul.f32 %v4190_v60, %v3134_v44 }
 0xa20   : > { %v3158_v30 = vmul.f32 %v3787_v46, %v3150_v25  ;;  %v3165_v32 = vadd.f32 %v3788_v29, %v3157_v51  ;;  %v3799_v25 = vld [vmem:[%s763_s5] ss:$0 sm:$0xff] }
 0xa22   : > { %v3166_v33 = vadd.f32 %v3788_v29, %v3158_v30 }
 0xa24   : > { %v3167_v50 = vpack.c.bf16 %v3166_v33, %v3165_v32 }
 0xa26   : > { %3982 = vmatmul.mubr.msk.bf16.vlgmr.msra.gmra.mrb[36].mxu0 %vm961_vm2, %v3167_v50 }
 0xaf9   : > { %v3228_v16 = vpop.f32.mrb[36].mxu0 }
 0xafa   : > { %v3229_v17 = vadd.f32 %v3789_v49, %v3228_v16  ;;  %v3983_v2 = vpop.f32.mrb[37].mxu0  ;;  %v4202_v16 = vld [vmem:[%s5680_s1 + $0x8] sm:$0xff] (!%p3801_p0)  }
 0xafb   : > { %v3231_v40 = vpop.f32.mrb[38].mxu0 }
 0xafc   : > { %v3237_v41 = vmul.f32 0.044715, %v3229_v17  ;;  %v3232_v55 = vadd.f32 %v3789_v49, %v3231_v40  ;;  %v3984_v35 = vpop.f32.mrb[39].mxu0  ;;  %v3235_v38 = vmul.f32 0.5, %v3229_v17  ;;  %v4598_v49 = vmov (!%p3801_p0), 0.0  }
 0xafd   : > { %3997 = vmatprep.subr.bf16.mxu0 (!%p3801_p0), %v4598_v49  ;;  %4001 = vmatprep.mubr.msk.bf16.mxu0 (!%p3801_p0), %vm4599_vm8, %v4598_v49 }
 0xafe   : > { %v3239_v39 = vmul.f32 %v3237_v41, %v3229_v17  ;;  %v3238_v27 = vmul.f32 0.044715, %v3232_v55  ;;  %v3236_v52 = vmul.f32 0.5, %v3232_v55  ;;  %3998 = vmatpush3.bf16.msra.mxu0 (!%p3801_p0), %v4201_v36  ;;  %v3802_v41 = vld [vmem:[%s5681_s29] ss:$0 sm:$0xff] (!%p3801_p0) }
 0xaff   : > { %3999 = vmatprep.subr.bf16.mxu0 (!%p3801_p0), %v4598_v49 }
 0xb00   : > { %v3241_v56 = vmul.f32 %v3239_v39, %v3229_v17  ;;  %v3240_v58 = vmul.f32 %v3238_v27, %v3232_v55 }
 0xb02   : > { %v3243_v59 = vadd.f32 %v3241_v56, %v3229_v17  ;;  %v3242_v62 = vmul.f32 %v3240_v58, %v3232_v55  ;;  %4000 = vmatpush3.bf16.msra.mxu0 (!%p3801_p0), %v4202_v16 }
 0xb04   : > { %v3245_v63 = vmul.f32 0.7978846, %v3243_v59  ;;  %v3244_v0 = vadd.f32 %v3242_v62, %v3232_v55 }
 0xb06   : > { %4191 = vtanh.f32 %v3245_v63  ;;  %v3246_v31 = vmul.f32 0.7978846, %v3244_v0 }
 0xb08   : > { %4193 = vtanh.f32 %v3246_v31 }
 0xb10   : > { %v4192_v1 = vpop.eup %4191 }
 0xb11   : > { %v3249_v37 = vadd.f32 1.0, %v4192_v1 }
 0xb12   : > { %v4194_v6 = vpop.eup %4193 }
 0xb13   : > { %v3250_v4 = vadd.f32 1.0, %v4194_v6  ;;  %v3251_v24 = vmul.f32 %v3249_v37, %v3235_v38 }
 0xb15   : > { %v3252_v8 = vmul.f32 %v3250_v4, %v3236_v52 }
 0xb17   : > { %v3253_v28 = vpack.c.bf16 %v3252_v8, %v3251_v24 }
 0xb19   : > { %3994 = vmatmul.mubr.msk.bf16.vlgmr.msra.gmra.mrb[36].mxu1 %vm3293_vm7, %v3253_v28 }
 0xbec   : > { %v3331_v10 = vpop.f32.mrb[36].mxu1 }
 0xbed   : > { %v3332_v61 = vadd.f32 %v3793_v9, %v3331_v10  ;;  %v3995_v11 = vpop.f32.mrb[37].mxu1 }
 0xbee   : > { %v3334_v12 = vpop.f32.mrb[38].mxu1 }
 0xbef   : > { %v3335_v13 = vadd.f32 %v3793_v9, %v3334_v12  ;;  %v3996_v14 = vpop.f32.mrb[39].mxu1  ;;  %v3338_v45 = vadd.f32 %v3332_v61, %v3165_v32  ;;  %v3800_v32 = vld [vmem:[%s879_s16] ss:$0 sm:$0xff] }
 0xbf1   : > { %v3342_v5 = vsel %vm961_vm2, %v3338_v45, 0.0  ;;  %v3339_v15 = vadd.f32 %v3335_v13, %v3166_v33 }
 0xbf2   : > { %3343 = vadd.xlane.f32.xlu0 %v3342_v5 }
 0xbf3   : > { %v3345_v44 = vsel %vm961_vm2, %v3339_v15, 0.0 }
 0xbf4   : > { %3346 = vadd.xlane.f32.xlu1 %v3345_v44 }
 0xc7f   : > { %v3344_v43 = vpop.xlane.xlu0 %3343 }
 0xc80   : > { %v3348_v42 = vmul.f32 0.03125, %v3344_v43 }
 0xc81   : > { %v3347_v7 = vpop.xlane.xlu1 %3346 }
 0xc82   : > { %v3350_v18 = vsub.f32 %v3338_v45, %v3348_v42  ;;  %v3349_v19 = vmul.f32 0.03125, %v3347_v7 }
 0xc84   : > { %v3351_v20 = vsub.f32 %v3339_v15, %v3349_v19  ;;  %v3352_v47 = vmul.f32 %v3350_v18, %v3350_v18 }
 0xc86   : > { %v3354_v21 = vsel %vm961_vm2, %v3352_v47, 0.0  ;;  %v3353_v22 = vmul.f32 %v3351_v20, %v3351_v20 }
 0xc87   : > { %3355 = vadd.xlane.f32.xlu0 %v3354_v21 }
 0xc88   : > { %v3357_v48 = vsel %vm961_vm2, %v3353_v22, 0.0 }
 0xc89   : > { %3358 = vadd.xlane.f32.xlu1 %v3357_v48 }
 0xd14   : > { %v3356_v23 = vpop.xlane.xlu0 %3355 }
 0xd15   : > { %v3360_v26 = vmul.f32 0.03125, %v3356_v23 }
 0xd16   : > { %v3359_v53 = vpop.xlane.xlu1 %3358 }
 0xd17   : > { %v3362_v46 = vadd.f32 1e-12, %v3360_v26  ;;  %v3361_v54 = vmul.f32 0.03125, %v3359_v53 }
 0xd19   : > { %4195 = vrsqrt.f32 %v3362_v46  ;;  %v3363_v60 = vadd.f32 1e-12, %v3361_v54 }
 0xd1b   : > { %4197 = vrsqrt.f32 %v3363_v60 }
 0xd23   : > { %v4196_v51 = vpop.eup %4195 }
 0xd24   : > { %v3366_v29 = vmul.f32 %v4196_v51, %v3350_v18 }
 0xd25   : > { %v4198_v30 = vpop.eup %4197 }
 0xd26   : > { %v3374_v33 = vmul.f32 %v3799_v25, %v3366_v29  ;;  %v3367_v50 = vmul.f32 %v4198_v30, %v3351_v20  ;;  %3389 = sbr.rel (%p3801_p0) target bundleno = 3603 (0xe13), region = 132 }
 0xd28   : > { %v3382_v57 = vadd.f32 %v3800_v32, %v3374_v33  ;;  %v3375_v3 = vmul.f32 %v3799_v25, %v3367_v50 }
 0xd2a   : > { %3384 = vst.msk [vmem:[#allocation14] sm:$0xff] %vm961_vm2, %v3382_v57  ;;  %v3383_v34 = vadd.f32 %v3800_v32, %v3375_v3 }
 0xd2c   : > { %3385 = vst.msk [vmem:[#allocation14 + $0x8] sm:$0xff] %vm961_vm2, %v3383_v34  ;;  %v3391_v17 = vrot.slane (!%p3801_p0), %v3383_v34, 7 }
 0xd2e   : > { %v3394_v2 = vsel %vm3393_vm9, %v3382_v57, %v3391_v17 }
 0xd2f   : > { %v3395_v40 = vpack.c.bf16 %v3394_v2, %v3394_v2 }
 0xd31   : > { %4002 = vmatmul.mubr.msk.bf16.vlgmr.msra.gmra.mrb[0].mxu0 %vm961_vm2, %v3395_v40 }
 0xe04   : > { %v3456_v55 = vpop.f32.mrb[0].mxu0 }
 0xe05   : > { %v3457_v35 = vadd.f32 %v3802_v41, %v3456_v55  ;;  %v4003_v39 = vpop.f32.mrb[1].mxu0 }
 0xe06   : > { %v3459_v27 = vpop.f32.mrb[2].mxu0 }
 0xe07   : > { %4203 = vtanh.f32 %v3457_v35  ;;  %v4004_v56 = vpop.f32.mrb[3].mxu0 }
 0xe11   : > { %v4204_v58 = vpop.eup %4203 }
 0xe12   : > { %3464 = vst.msk [vmem:[#allocation15] sm:$0x3] %vm3463_vm10, %v4204_v58 }
 0xe13 PF: > { %p4069_p11 = scmp.eq.s32.totalorder %s4717_s0, 1  ;;  %s4600_s18 = smov [#allocation14]  }
 0xe14   : > { %s3471_s30 = sshll.u32 %s4600_s18, 4  ;;  %s3472_s30 = int_to_ptr.vmem [resolvable:$true] %s3471_s30 }
 0xe15   : > { %s4471_s4 = scalar_lea.vmem %s3472_s30, 256  ;;  %p4478_p7 = scmp.lt.s32.totalorder %s3472_s30, %s3472_s30 }
 0xe16   : > { %p4472_p12 = scmp.ne.s32.totalorder %s3472_s30, %s4471_s4  ;;  %p4479_p6 = scmp.lt.s32.totalorder %s4471_s4, %s4471_s4 }
 0xe18   : > { %p4473_p9 = pnand %p4472_p12, %p4069_p11  ;;  %p4480_p8 = por %p4479_p6, %p4478_p7 }
 0xe1a   : > { %p4474_p1 = pneg %p4473_p9 }
 0xe1c   : > { %p4481_p13 = pnand %p4480_p8, %p4474_p1 }
 0xe1e   : > { %4484 = shalt.err (!%p4481_p13)
}
 0xe1f   : > { %s5682_s15 = sld [smem:[#allocation39_spill]] }
 0xe25   : > { %s4485_s17 = scalar_lea.hbm %s5682_s15, 256 }
 0xe26   : > { %p4486_p5 = scmp.ne.s32.totalorder %s5682_s15, %s4485_s17  ;;  %p4491_p10 = scmp.lt.u32.totalorder %s4485_s17, %s5682_s15 }
 0xe28   : > { %p4487_p4 = pnand %p4486_p5, %p4069_p11 }
 0xe2a   : > { %p4488_p2 = pneg %p4487_p4 }
 0xe2c   : > { %p4493_p3 = pnand %p4491_p10, %p4488_p2 }
 0xe2e   : > { %4496 = shalt.err (!%p4493_p3)
}
 0xe2f   : > { %s4601_s23 = smov 128   ;;  %s4602_s8 = smov [#allocation15]  }
 0xe30   : > { %4028 = dma.vmem_to_hbm [thread:$0]  (%p4069_p11), %s3472_s30, 256, %s5682_s15, [#allocation4], %s4601_s23, %s4601_s23, %s4596_s26  }
 0xe31   : > { %s3485_s5 = sshll.u32 %s4602_s8, 4  ;;  %s3486_s5 = int_to_ptr.vmem [resolvable:$true] %s3485_s5 }
 0xe32   : > { %s4497_s9 = scalar_lea.vmem %s3486_s5, 32  ;;  %p4504_p1 = scmp.lt.s32.totalorder %s3486_s5, %s3486_s5 }
 0xe33   : > { %p4498_p0 = scmp.ne.s32.totalorder %s3486_s5, %s4497_s9  ;;  %p4505_p7 = scmp.lt.s32.totalorder %s4497_s9, %s4497_s9 }
 0xe35   : > { %p4499_p12 = pnand %p4498_p0, %p4069_p11  ;;  %p4506_p6 = por %p4505_p7, %p4504_p1 }
 0xe37   : > { %p4500_p9 = pneg %p4499_p12 }
 0xe39   : > { %p4507_p8 = pnand %p4506_p6, %p4500_p9 }
 0xe3b   : > { %4510 = shalt.err (!%p4507_p8)
}
 0xe3c   : > { %s5683_s11 = sld [smem:[#allocation40_spill]] }
 0xe42   : > { %s4511_s16 = scalar_lea.hbm %s5683_s11, 32 }
 0xe43   : > { %p4512_p13 = scmp.ne.s32.totalorder %s5683_s11, %s4511_s16  ;;  %p4517_p2 = scmp.lt.u32.totalorder %s4511_s16, %s5683_s11 }
 0xe45   : > { %p4513_p5 = pnand %p4512_p13, %p4069_p11 }
 0xe47   : > { %p4514_p4 = pneg %p4513_p5 }
 0xe49   : > { %p4519_p10 = pnand %p4517_p2, %p4514_p4 }
 0xe4b   : > { %4522 = shalt.err (!%p4519_p10)
}
 0xe4c   : > { %4030 = dma.vmem_to_hbm [thread:$0]  (%p4069_p11), %s3486_s5, 32, %s5683_s11, [#allocation16]  }
 0xe4d   : > { %4552 = dma.done.wait (%p4069_p11), [#allocation4], 256  }
 0xe4e   : > { %4554 = vsyncadd (%p4069_p11), [#allocation4], 4294967040 }
 0xe4f   : > { %4556 = dma.done.wait (%p4069_p11), [#allocation16], 32  }
 0xe50   : > { %4558 = vsyncadd (%p4069_p11), [#allocation16], 4294967264 }
 0xe51 PF: > { %s5684_s30 = sld [smem:[#allocation23_spill]]  ;;  %s5685_s2 = sld [smem:[#allocation22_spill]] }
 0xe52   : > { %s5686_s29 = sld [smem:[#allocation24_spill]]  ;;  %s5687_s27 = smov %s4565_s28 }
 0xe57   : > { %p30_p3 = scmp.ge.s32.totalorder %s5684_s30, 4   ;;  %s5688_s28 = smov %s5685_s2 }
 0xe59   :  { %32 = sbr.rel (!%p30_p3) target bundleno = 22 (0x16), region = 229 }
 0xe60   :  { %3502 = vsyncpa [#allocation3], 1 }
 0xe61   :  { %3504 = vsyncpa [#allocation3 + $0x1], 1 }
 0xe62   :  { %3505 = vsyncpa [#allocation6], 1 }
 0xe63   :  { %3506 = vsyncpa [#allocation4], 1 }
 0xe64   :  { %3508 = vsyncpa [#allocation4 + $0x1], 1 }
 0xe65   :  { %3509 = vsyncpa [#allocation16], 1 }

</bundles_post_ra>
